<compile_context>
chip_gen: v6e
topology: v6e:2x2x1
jax: 0.10.0
libtpu: 0.0.40
codegen_flags: <defaults>
</compile_context>

<pallas_src>
import functools

import numpy as np
import jax
import jax.numpy as jnp
from jax import lax
from jax.experimental import pallas as pl
from jax.experimental.pallas import tpu as pltpu

EPS = 1e-5


def _border_masks(H, W, HWp):
    """(9, HWp) float32 0/1 masks.

    mask[t, h*W + w] = 1 iff the tap's source pixel (h+dh, w+dw) lies inside
    the image, for tap t = (dh+1)*3 + (dw+1).  Flat positions >= H*W (lane
    padding) are 0 for every tap, so mask[4] doubles as the "valid pixel" mask
    used by InstanceNorm when the lane axis is padded.
    """
    HW = H * W
    masks = np.zeros((9, HWp), np.float32)
    t = 0
    for dh in (-1, 0, 1):
        for dw in (-1, 0, 1):
            m = np.zeros((H, W), np.float32)
            m[max(0, -dh):H - max(0, dh), max(0, -dw):W - max(0, dw)] = 1.0
            masks[t, :HW] = m.reshape(-1)
            t += 1
    return masks


def residual_block_kernel(x_ref, m_ref, w1_ref, w2_ref, o_ref, *,
                          H, W, C, HWp, padded, compute_dtype):
    HW = H * W
    x = x_ref[0]                                   # (C, HWp) f32, lane-dense
    valid = m_ref[4:5, :] if padded else None      # 1 on real pixels, 0 on pad

    def conv3x3(inp, w_ref):
        # 9-tap matmul-accumulate: acc += W_t(C,C) @ shifted_t(C,HWp).
        # No im2col scratch; accumulation happens in f32 (MRB on v7x).
        acc = None
        t = 0
        for dh in (-1, 0, 1):
            for dw in (-1, 0, 1):
                s = dh * W + dw                    # flat source offset of tap
                if s == 0:
                    shifted = inp
                else:
                    # shifted[p] = inp[(p + s) mod HWp]; wrap-around / padding
                    # sources are zeroed by the precomputed border mask.
                    shifted = pltpu.roll(inp, shift=(-s) % HWp, axis=1)
                if dh == 0 and dw == 0:
                    tap = shifted                  # centre tap always in bounds
                else:
                    tap = shifted * m_ref[t:t + 1, :]
                part = jnp.dot(w_ref[t], tap.astype(compute_dtype),
                               preferred_element_type=jnp.float32)
                acc = part if acc is None else acc + part
                t += 1
        return acc                                 # (C, HWp) f32

    def instance_norm(y):
        # Two-pass (mean, then centered variance) — matches the reference and
        # avoids E[y^2] - mean^2 cancellation.  Stats cover exactly HW pixels.
        inv_n = 1.0 / HW
        ym = y * valid if padded else y
        mean = jnp.sum(ym, axis=1, keepdims=True) * inv_n
        centered = y - mean
        cm = centered * valid if padded else centered
        var = jnp.sum(cm * cm, axis=1, keepdims=True) * inv_n
        return centered * lax.rsqrt(var + EPS)

    y = conv3x3(x, w1_ref)
    y = jnp.maximum(instance_norm(y), 0.0)
    y = conv3x3(y, w2_ref)
    o_ref[0] = (x + instance_norm(y)).astype(o_ref.dtype)


def residual_block(x_nchw, w1, w2, *, use_bf16=False):
    """x_nchw: (N, C, H, W); w1, w2: (C_out, C_in, 3, 3) in PyTorch layout.

    use_bf16=True casts taps/weights to bf16 for the MXU (f32 accumulation);
    it needs a looser tolerance (~1e-2) against the f32 XLA reference.
    """
    N, C, H, W = x_nchw.shape
    HW = H * W
    HWp = max(128, ((HW + 127) // 128) * 128)      # lane-dense spatial axis
    padded = HWp != HW
    compute_dtype = jnp.bfloat16 if use_bf16 else jnp.float32

    # Contiguous reshape only (no NCHW<->NHWC transpose).
    x_flat = x_nchw.reshape(N, C, HW).astype(jnp.float32)
    if padded:
        x_flat = jnp.pad(x_flat, ((0, 0), (0, 0), (0, HWp - HW)))

    # (C_out, C_in, 3, 3) -> (9, C_out, C_in); slab t = kh*3 + kw.
    w1k = jnp.transpose(w1, (2, 3, 0, 1)).reshape(9, C, C).astype(compute_dtype)
    w2k = jnp.transpose(w2, (2, 3, 0, 1)).reshape(9, C, C).astype(compute_dtype)
    masks = jnp.asarray(_border_masks(H, W, HWp))

    kernel = functools.partial(residual_block_kernel, H=H, W=W, C=C, HWp=HWp,
                               padded=padded, compute_dtype=compute_dtype)

    # VMEM budget: double-buffered x/out blocks, single-buffered constants,
    # plus the compiler-materialized (C, HWp) temporaries (shifted tap, masked
    # tap, conv accumulator, centered, relu, residual) and internal scratch.
    blk = C * HWp * 4
    wbytes = 9 * C * C * jnp.dtype(compute_dtype).itemsize
    need = (2 * blk + 2 * blk          # x / out (double-buffered)
            + 9 * HWp * 4              # border masks
            + 2 * wbytes               # w1k, w2k
            + 6 * blk                  # compiler temporaries
            + (4 << 20))               # compiler-internal scratch headroom
    try:
        cap = int(pltpu.get_tpu_info().vmem_capacity_bytes)
    except Exception:                  # query unavailable -> assume v7x (64 MiB)
        cap = 64 << 20
    hard_cap = min(cap - (12 << 20), 96 << 20)   # ~52 MiB on v7x, 96 on v5e/v6e
    vmem_limit = int(min(max(need, 32 << 20), hard_cap))

    def call(single_buffer_consts):
        const_kw = ({"pipeline_mode": pl.Buffered(1)}
                    if single_buffer_consts else {})
        grid_spec = pltpu.PrefetchScalarGridSpec(
            num_scalar_prefetch=0,
            grid=(N,),
            in_specs=[
                pl.BlockSpec((1, C, HWp), lambda n: (n, 0, 0)),          # x
                pl.BlockSpec((9, HWp), lambda n: (0, 0), **const_kw),    # masks
                pl.BlockSpec((9, C, C), lambda n: (0, 0, 0), **const_kw),  # w1
                pl.BlockSpec((9, C, C), lambda n: (0, 0, 0), **const_kw),  # w2
            ],
            out_specs=pl.BlockSpec((1, C, HWp), lambda n: (n, 0, 0)),
        )
        return pl.pallas_call(
            kernel,
            out_shape=jax.ShapeDtypeStruct((N, C, HWp), jnp.float32),
            grid_spec=grid_spec,
            compiler_params=pltpu.CompilerParams(
                dimension_semantics=("parallel",),
                vmem_limit_bytes=vmem_limit,
            ),
        )(x_flat, masks, w1k, w2k)

    try:
        out_flat = call(True)
    except Exception:
        # JAX version without BlockSpec pipeline_mode / Buffered(1): fall back
        # to default double-buffering of the (small) constant inputs.
        out_flat = call(False)

    if padded:
        out_flat = out_flat[:, :, :HW]
    return out_flat.reshape(N, C, H, W)


def residual_block_reference(x, w1, w2):
    """Pure-JAX (XLA) reference in NCHW, mirroring the PyTorch module."""
    dn = lax.conv_dimension_numbers(x.shape, w1.shape, ('NCHW', 'OIHW', 'NCHW'))

    def inorm(y):
        m = jnp.mean(y, axis=(2, 3), keepdims=True)
        v = jnp.mean((y - m) ** 2, axis=(2, 3), keepdims=True)
        return (y - m) / jnp.sqrt(v + EPS)

    y = lax.conv_general_dilated(x, w1, (1, 1), 'SAME', dimension_numbers=dn)
    y = jnp.maximum(inorm(y), 0.0)
    y = lax.conv_general_dilated(y, w2, (1, 1), 'SAME', dimension_numbers=dn)
    return x + inorm(y)


if __name__ == "__main__":
    N, C, H, W = 2, 4, 16, 16
    key = jax.random.PRNGKey(0)
    kx, k1, k2 = jax.random.split(key, 3)

    x = jax.random.normal(kx, (N, C, H, W), dtype=jnp.float32)
    # PyTorch Conv2d layout (C_out, C_in, 3, 3).
    w1 = 0.1 * jax.random.normal(k1, (C, C, 3, 3), dtype=jnp.float32)
    w2 = 0.1 * jax.random.normal(k2, (C, C, 3, 3), dtype=jnp.float32)

    out = jax.block_until_ready(residual_block(x, w1, w2))
    ref = jax.block_until_ready(residual_block_reference(x, w1, w2))

    assert out.shape == (N, C, H, W)
    err = float(jnp.max(jnp.abs(out - ref)))
    assert jnp.allclose(out, ref, atol=1e-4, rtol=1e-4), err
    print("KERNEL_OK")
</pallas_src>

<mosaic_0001>
module attributes {stable_mosaic.version = 11 : i64} {
  func.func @residual_block_kernel(%arg0: i32, %arg1: memref<1x4x256xf32, #tpu.memory_space<vmem>>, %arg2: memref<9x256xf32, #tpu.memory_space<vmem>>, %arg3: memref<9x4x4xf32, #tpu.memory_space<vmem>>, %arg4: memref<9x4x4xf32, #tpu.memory_space<vmem>>, %arg5: memref<1x4x256xf32, #tpu.memory_space<vmem>>) attributes {dimension_semantics = [#tpu.dimension_semantics<parallel>], iteration_bounds = array<i64: 2>, scalar_prefetch = 0 : i64, scratch_operands = 0 : i64, tpu.core_type = #tpu.core_type<tc>, window_params = [{transform_indices = @transform_0, window_bounds = array<i64: 1, 4, 256>}, {pipeline_mode = #tpu.pipeline_mode<synchronous>, transform_indices = @transform_1, window_bounds = array<i64: 9, 256>}, {pipeline_mode = #tpu.pipeline_mode<synchronous>, transform_indices = @transform_2, window_bounds = array<i64: 9, 4, 4>}, {pipeline_mode = #tpu.pipeline_mode<synchronous>, transform_indices = @transform_3, window_bounds = array<i64: 9, 4, 4>}, {transform_indices = @transform_4, window_bounds = array<i64: 1, 4, 256>}]} {
    %c0 = arith.constant 0 : index
    %c0_0 = arith.constant 0 : index
    %c0_1 = arith.constant 0 : index
    %0 = vector.load %arg1[%c0, %c0_0, %c0_1] : memref<1x4x256xf32, #tpu.memory_space<vmem>>, vector<1x4x256xf32>
    %1 = vector.shape_cast %0 : vector<1x4x256xf32> to vector<4x256xf32>
    %c17_i32 = arith.constant 17 : i32
    %2 = tpu.dynamic_rotate %1 by %c17_i32 dim 1 : vector<4x256xf32>, i32 -> vector<4x256xf32>
    %c0_2 = arith.constant 0 : index
    %c0_3 = arith.constant 0 : index
    %3 = vector.load %arg2[%c0_2, %c0_3] : memref<9x256xf32, #tpu.memory_space<vmem>>, vector<1x256xf32>
    %4 = vector.broadcast %3 : vector<1x256xf32> to vector<4x256xf32>
    %5 = arith.mulf %2, %4 : vector<4x256xf32>
    %c0_4 = arith.constant 0 : index
    %c0_5 = arith.constant 0 : index
    %c0_6 = arith.constant 0 : index
    %6 = vector.load %arg3[%c0_4, %c0_5, %c0_6] : memref<9x4x4xf32, #tpu.memory_space<vmem>>, vector<1x4x4xf32>
    %7 = vector.shape_cast %6 : vector<1x4x4xf32> to vector<4x4xf32>
    %cst = arith.constant dense<0.000000e+00> : vector<4x256xf32>
    %8 = tpu.matmul %7, %5, %cst {dimension_numbers = #tpu.dot_dimension_numbers<[1], [0], [0], [1], [0, 0, 1, 1], [], []>} : vector<4x4xf32>, vector<4x256xf32>, vector<4x256xf32> -> vector<4x256xf32>
    %c16_i32 = arith.constant 16 : i32
    %9 = tpu.dynamic_rotate %1 by %c16_i32 dim 1 : vector<4x256xf32>, i32 -> vector<4x256xf32>
    %c1 = arith.constant 1 : index
    %c0_7 = arith.constant 0 : index
    %10 = vector.load %arg2[%c1, %c0_7] : memref<9x256xf32, #tpu.memory_space<vmem>>, vector<1x256xf32>
    %11 = vector.broadcast %10 : vector<1x256xf32> to vector<4x256xf32>
    %12 = arith.mulf %9, %11 : vector<4x256xf32>
    %c1_8 = arith.constant 1 : index
    %c0_9 = arith.constant 0 : index
    %c0_10 = arith.constant 0 : index
    %13 = vector.load %arg3[%c1_8, %c0_9, %c0_10] : memref<9x4x4xf32, #tpu.memory_space<vmem>>, vector<1x4x4xf32>
    %14 = vector.shape_cast %13 : vector<1x4x4xf32> to vector<4x4xf32>
    %cst_11 = arith.constant dense<0.000000e+00> : vector<4x256xf32>
    %15 = tpu.matmul %14, %12, %cst_11 {dimension_numbers = #tpu.dot_dimension_numbers<[1], [0], [0], [1], [0, 0, 1, 1], [], []>} : vector<4x4xf32>, vector<4x256xf32>, vector<4x256xf32> -> vector<4x256xf32>
    %16 = arith.addf %8, %15 : vector<4x256xf32>
    %c15_i32 = arith.constant 15 : i32
    %17 = tpu.dynamic_rotate %1 by %c15_i32 dim 1 : vector<4x256xf32>, i32 -> vector<4x256xf32>
    %c2 = arith.constant 2 : index
    %c0_12 = arith.constant 0 : index
    %18 = vector.load %arg2[%c2, %c0_12] : memref<9x256xf32, #tpu.memory_space<vmem>>, vector<1x256xf32>
    %19 = vector.broadcast %18 : vector<1x256xf32> to vector<4x256xf32>
    %20 = arith.mulf %17, %19 : vector<4x256xf32>
    %c2_13 = arith.constant 2 : index
    %c0_14 = arith.constant 0 : index
    %c0_15 = arith.constant 0 : index
    %21 = vector.load %arg3[%c2_13, %c0_14, %c0_15] : memref<9x4x4xf32, #tpu.memory_space<vmem>>, vector<1x4x4xf32>
    %22 = vector.shape_cast %21 : vector<1x4x4xf32> to vector<4x4xf32>
    %cst_16 = arith.constant dense<0.000000e+00> : vector<4x256xf32>
    %23 = tpu.matmul %22, %20, %cst_16 {dimension_numbers = #tpu.dot_dimension_numbers<[1], [0], [0], [1], [0, 0, 1, 1], [], []>} : vector<4x4xf32>, vector<4x256xf32>, vector<4x256xf32> -> vector<4x256xf32>
    %24 = arith.addf %16, %23 : vector<4x256xf32>
    %c1_i32 = arith.constant 1 : i32
    %25 = tpu.dynamic_rotate %1 by %c1_i32 dim 1 : vector<4x256xf32>, i32 -> vector<4x256xf32>
    %c3 = arith.constant 3 : index
    %c0_17 = arith.constant 0 : index
    %26 = vector.load %arg2[%c3, %c0_17] : memref<9x256xf32, #tpu.memory_space<vmem>>, vector<1x256xf32>
    %27 = vector.broadcast %26 : vector<1x256xf32> to vector<4x256xf32>
    %28 = arith.mulf %25, %27 : vector<4x256xf32>
    %c3_18 = arith.constant 3 : index
    %c0_19 = arith.constant 0 : index
    %c0_20 = arith.constant 0 : index
    %29 = vector.load %arg3[%c3_18, %c0_19, %c0_20] : memref<9x4x4xf32, #tpu.memory_space<vmem>>, vector<1x4x4xf32>
    %30 = vector.shape_cast %29 : vector<1x4x4xf32> to vector<4x4xf32>
    %cst_21 = arith.constant dense<0.000000e+00> : vector<4x256xf32>
    %31 = tpu.matmul %30, %28, %cst_21 {dimension_numbers = #tpu.dot_dimension_numbers<[1], [0], [0], [1], [0, 0, 1, 1], [], []>} : vector<4x4xf32>, vector<4x256xf32>, vector<4x256xf32> -> vector<4x256xf32>
    %32 = arith.addf %24, %31 : vector<4x256xf32>
    %c4 = arith.constant 4 : index
    %c0_22 = arith.constant 0 : index
    %c0_23 = arith.constant 0 : index
    %33 = vector.load %arg3[%c4, %c0_22, %c0_23] : memref<9x4x4xf32, #tpu.memory_space<vmem>>, vector<1x4x4xf32>
    %34 = vector.shape_cast %33 : vector<1x4x4xf32> to vector<4x4xf32>
    %cst_24 = arith.constant dense<0.000000e+00> : vector<4x256xf32>
    %35 = tpu.matmul %34, %1, %cst_24 {dimension_numbers = #tpu.dot_dimension_numbers<[1], [0], [0], [1], [0, 0, 1, 1], [], []>} : vector<4x4xf32>, vector<4x256xf32>, vector<4x256xf32> -> vector<4x256xf32>
    %36 = arith.addf %32, %35 : vector<4x256xf32>
    %c255_i32 = arith.constant 255 : i32
    %37 = tpu.dynamic_rotate %1 by %c255_i32 dim 1 : vector<4x256xf32>, i32 -> vector<4x256xf32>
    %c5 = arith.constant 5 : index
    %c0_25 = arith.constant 0 : index
    %38 = vector.load %arg2[%c5, %c0_25] : memref<9x256xf32, #tpu.memory_space<vmem>>, vector<1x256xf32>
    %39 = vector.broadcast %38 : vector<1x256xf32> to vector<4x256xf32>
    %40 = arith.mulf %37, %39 : vector<4x256xf32>
    %c5_26 = arith.constant 5 : index
    %c0_27 = arith.constant 0 : index
    %c0_28 = arith.constant 0 : index
    %41 = vector.load %arg3[%c5_26, %c0_27, %c0_28] : memref<9x4x4xf32, #tpu.memory_space<vmem>>, vector<1x4x4xf32>
    %42 = vector.shape_cast %41 : vector<1x4x4xf32> to vector<4x4xf32>
    %cst_29 = arith.constant dense<0.000000e+00> : vector<4x256xf32>
    %43 = tpu.matmul %42, %40, %cst_29 {dimension_numbers = #tpu.dot_dimension_numbers<[1], [0], [0], [1], [0, 0, 1, 1], [], []>} : vector<4x4xf32>, vector<4x256xf32>, vector<4x256xf32> -> vector<4x256xf32>
    %44 = arith.addf %36, %43 : vector<4x256xf32>
    %c241_i32 = arith.constant 241 : i32
    %45 = tpu.dynamic_rotate %1 by %c241_i32 dim 1 : vector<4x256xf32>, i32 -> vector<4x256xf32>
    %c6 = arith.constant 6 : index
    %c0_30 = arith.constant 0 : index
    %46 = vector.load %arg2[%c6, %c0_30] : memref<9x256xf32, #tpu.memory_space<vmem>>, vector<1x256xf32>
    %47 = vector.broadcast %46 : vector<1x256xf32> to vector<4x256xf32>
    %48 = arith.mulf %45, %47 : vector<4x256xf32>
    %c6_31 = arith.constant 6 : index
    %c0_32 = arith.constant 0 : index
    %c0_33 = arith.constant 0 : index
    %49 = vector.load %arg3[%c6_31, %c0_32, %c0_33] : memref<9x4x4xf32, #tpu.memory_space<vmem>>, vector<1x4x4xf32>
    %50 = vector.shape_cast %49 : vector<1x4x4xf32> to vector<4x4xf32>
    %cst_34 = arith.constant dense<0.000000e+00> : vector<4x256xf32>
    %51 = tpu.matmul %50, %48, %cst_34 {dimension_numbers = #tpu.dot_dimension_numbers<[1], [0], [0], [1], [0, 0, 1, 1], [], []>} : vector<4x4xf32>, vector<4x256xf32>, vector<4x256xf32> -> vector<4x256xf32>
    %52 = arith.addf %44, %51 : vector<4x256xf32>
    %c240_i32 = arith.constant 240 : i32
    %53 = tpu.dynamic_rotate %1 by %c240_i32 dim 1 : vector<4x256xf32>, i32 -> vector<4x256xf32>
    %c7 = arith.constant 7 : index
    %c0_35 = arith.constant 0 : index
    %54 = vector.load %arg2[%c7, %c0_35] : memref<9x256xf32, #tpu.memory_space<vmem>>, vector<1x256xf32>
    %55 = vector.broadcast %54 : vector<1x256xf32> to vector<4x256xf32>
    %56 = arith.mulf %53, %55 : vector<4x256xf32>
    %c7_36 = arith.constant 7 : index
    %c0_37 = arith.constant 0 : index
    %c0_38 = arith.constant 0 : index
    %57 = vector.load %arg3[%c7_36, %c0_37, %c0_38] : memref<9x4x4xf32, #tpu.memory_space<vmem>>, vector<1x4x4xf32>
    %58 = vector.shape_cast %57 : vector<1x4x4xf32> to vector<4x4xf32>
    %cst_39 = arith.constant dense<0.000000e+00> : vector<4x256xf32>
    %59 = tpu.matmul %58, %56, %cst_39 {dimension_numbers = #tpu.dot_dimension_numbers<[1], [0], [0], [1], [0, 0, 1, 1], [], []>} : vector<4x4xf32>, vector<4x256xf32>, vector<4x256xf32> -> vector<4x256xf32>
    %60 = arith.addf %52, %59 : vector<4x256xf32>
    %c239_i32 = arith.constant 239 : i32
    %61 = tpu.dynamic_rotate %1 by %c239_i32 dim 1 : vector<4x256xf32>, i32 -> vector<4x256xf32>
    %c8 = arith.constant 8 : index
    %c0_40 = arith.constant 0 : index
    %62 = vector.load %arg2[%c8, %c0_40] : memref<9x256xf32, #tpu.memory_space<vmem>>, vector<1x256xf32>
    %63 = vector.broadcast %62 : vector<1x256xf32> to vector<4x256xf32>
    %64 = arith.mulf %61, %63 : vector<4x256xf32>
    %c8_41 = arith.constant 8 : index
    %c0_42 = arith.constant 0 : index
    %c0_43 = arith.constant 0 : index
    %65 = vector.load %arg3[%c8_41, %c0_42, %c0_43] : memref<9x4x4xf32, #tpu.memory_space<vmem>>, vector<1x4x4xf32>
    %66 = vector.shape_cast %65 : vector<1x4x4xf32> to vector<4x4xf32>
    %cst_44 = arith.constant dense<0.000000e+00> : vector<4x256xf32>
    %67 = tpu.matmul %66, %64, %cst_44 {dimension_numbers = #tpu.dot_dimension_numbers<[1], [0], [0], [1], [0, 0, 1, 1], [], []>} : vector<4x4xf32>, vector<4x256xf32>, vector<4x256xf32> -> vector<4x256xf32>
    %68 = arith.addf %60, %67 : vector<4x256xf32>
    %cst_45 = arith.constant dense<0.000000e+00> : vector<4xf32>
    %69 = vector.multi_reduction <add>, %68, %cst_45 [1] : vector<4x256xf32> to vector<4xf32>
    %70 = vector.shape_cast %69 : vector<4xf32> to vector<4x1xf32>
    %cst_46 = arith.constant 3.906250e-03 : f32
    %71 = vector.broadcast %cst_46 : f32 to vector<4x1xf32>
    %72 = arith.mulf %70, %71 : vector<4x1xf32>
    %73 = vector.broadcast %72 : vector<4x1xf32> to vector<4x256xf32>
    %74 = arith.subf %68, %73 : vector<4x256xf32>
    %75 = arith.mulf %74, %74 : vector<4x256xf32>
    %cst_47 = arith.constant dense<0.000000e+00> : vector<4xf32>
    %76 = vector.multi_reduction <add>, %75, %cst_47 [1] : vector<4x256xf32> to vector<4xf32>
    %77 = vector.shape_cast %76 : vector<4xf32> to vector<4x1xf32>
    %cst_48 = arith.constant 3.906250e-03 : f32
    %78 = vector.broadcast %cst_48 : f32 to vector<4x1xf32>
    %79 = arith.mulf %77, %78 : vector<4x1xf32>
    %cst_49 = arith.constant 9.99999974E-6 : f32
    %80 = vector.broadcast %cst_49 : f32 to vector<4x1xf32>
    %81 = arith.addf %79, %80 : vector<4x1xf32>
    %82 = math.rsqrt %81 : vector<4x1xf32>
    %83 = vector.broadcast %82 : vector<4x1xf32> to vector<4x256xf32>
    %84 = arith.mulf %74, %83 : vector<4x256xf32>
    %cst_50 = arith.constant 0.000000e+00 : f32
    %85 = vector.broadcast %cst_50 : f32 to vector<4x256xf32>
    %86 = arith.maximumf %84, %85 : vector<4x256xf32>
    %c17_i32_51 = arith.constant 17 : i32
    %87 = tpu.dynamic_rotate %86 by %c17_i32_51 dim 1 : vector<4x256xf32>, i32 -> vector<4x256xf32>
    %c0_52 = arith.constant 0 : index
    %c0_53 = arith.constant 0 : index
    %88 = vector.load %arg2[%c0_52, %c0_53] : memref<9x256xf32, #tpu.memory_space<vmem>>, vector<1x256xf32>
    %89 = vector.broadcast %88 : vector<1x256xf32> to vector<4x256xf32>
    %90 = arith.mulf %87, %89 : vector<4x256xf32>
    %c0_54 = arith.constant 0 : index
    %c0_55 = arith.constant 0 : index
    %c0_56 = arith.constant 0 : index
    %91 = vector.load %arg4[%c0_54, %c0_55, %c0_56] : memref<9x4x4xf32, #tpu.memory_space<vmem>>, vector<1x4x4xf32>
    %92 = vector.shape_cast %91 : vector<1x4x4xf32> to vector<4x4xf32>
    %cst_57 = arith.constant dense<0.000000e+00> : vector<4x256xf32>
    %93 = tpu.matmul %92, %90, %cst_57 {dimension_numbers = #tpu.dot_dimension_numbers<[1], [0], [0], [1], [0, 0, 1, 1], [], []>} : vector<4x4xf32>, vector<4x256xf32>, vector<4x256xf32> -> vector<4x256xf32>
    %c16_i32_58 = arith.constant 16 : i32
    %94 = tpu.dynamic_rotate %86 by %c16_i32_58 dim 1 : vector<4x256xf32>, i32 -> vector<4x256xf32>
    %c1_59 = arith.constant 1 : index
    %c0_60 = arith.constant 0 : index
    %95 = vector.load %arg2[%c1_59, %c0_60] : memref<9x256xf32, #tpu.memory_space<vmem>>, vector<1x256xf32>
    %96 = vector.broadcast %95 : vector<1x256xf32> to vector<4x256xf32>
    %97 = arith.mulf %94, %96 : vector<4x256xf32>
    %c1_61 = arith.constant 1 : index
    %c0_62 = arith.constant 0 : index
    %c0_63 = arith.constant 0 : index
    %98 = vector.load %arg4[%c1_61, %c0_62, %c0_63] : memref<9x4x4xf32, #tpu.memory_space<vmem>>, vector<1x4x4xf32>
    %99 = vector.shape_cast %98 : vector<1x4x4xf32> to vector<4x4xf32>
    %cst_64 = arith.constant dense<0.000000e+00> : vector<4x256xf32>
    %100 = tpu.matmul %99, %97, %cst_64 {dimension_numbers = #tpu.dot_dimension_numbers<[1], [0], [0], [1], [0, 0, 1, 1], [], []>} : vector<4x4xf32>, vector<4x256xf32>, vector<4x256xf32> -> vector<4x256xf32>
    %101 = arith.addf %93, %100 : vector<4x256xf32>
    %c15_i32_65 = arith.constant 15 : i32
    %102 = tpu.dynamic_rotate %86 by %c15_i32_65 dim 1 : vector<4x256xf32>, i32 -> vector<4x256xf32>
    %c2_66 = arith.constant 2 : index
    %c0_67 = arith.constant 0 : index
    %103 = vector.load %arg2[%c2_66, %c0_67] : memref<9x256xf32, #tpu.memory_space<vmem>>, vector<1x256xf32>
    %104 = vector.broadcast %103 : vector<1x256xf32> to vector<4x256xf32>
    %105 = arith.mulf %102, %104 : vector<4x256xf32>
    %c2_68 = arith.constant 2 : index
    %c0_69 = arith.constant 0 : index
    %c0_70 = arith.constant 0 : index
    %106 = vector.load %arg4[%c2_68, %c0_69, %c0_70] : memref<9x4x4xf32, #tpu.memory_space<vmem>>, vector<1x4x4xf32>
    %107 = vector.shape_cast %106 : vector<1x4x4xf32> to vector<4x4xf32>
    %cst_71 = arith.constant dense<0.000000e+00> : vector<4x256xf32>
    %108 = tpu.matmul %107, %105, %cst_71 {dimension_numbers = #tpu.dot_dimension_numbers<[1], [0], [0], [1], [0, 0, 1, 1], [], []>} : vector<4x4xf32>, vector<4x256xf32>, vector<4x256xf32> -> vector<4x256xf32>
    %109 = arith.addf %101, %108 : vector<4x256xf32>
    %c1_i32_72 = arith.constant 1 : i32
    %110 = tpu.dynamic_rotate %86 by %c1_i32_72 dim 1 : vector<4x256xf32>, i32 -> vector<4x256xf32>
    %c3_73 = arith.constant 3 : index
    %c0_74 = arith.constant 0 : index
    %111 = vector.load %arg2[%c3_73, %c0_74] : memref<9x256xf32, #tpu.memory_space<vmem>>, vector<1x256xf32>
    %112 = vector.broadcast %111 : vector<1x256xf32> to vector<4x256xf32>
    %113 = arith.mulf %110, %112 : vector<4x256xf32>
    %c3_75 = arith.constant 3 : index
    %c0_76 = arith.constant 0 : index
    %c0_77 = arith.constant 0 : index
    %114 = vector.load %arg4[%c3_75, %c0_76, %c0_77] : memref<9x4x4xf32, #tpu.memory_space<vmem>>, vector<1x4x4xf32>
    %115 = vector.shape_cast %114 : vector<1x4x4xf32> to vector<4x4xf32>
    %cst_78 = arith.constant dense<0.000000e+00> : vector<4x256xf32>
    %116 = tpu.matmul %115, %113, %cst_78 {dimension_numbers = #tpu.dot_dimension_numbers<[1], [0], [0], [1], [0, 0, 1, 1], [], []>} : vector<4x4xf32>, vector<4x256xf32>, vector<4x256xf32> -> vector<4x256xf32>
    %117 = arith.addf %109, %116 : vector<4x256xf32>
    %c4_79 = arith.constant 4 : index
    %c0_80 = arith.constant 0 : index
    %c0_81 = arith.constant 0 : index
    %118 = vector.load %arg4[%c4_79, %c0_80, %c0_81] : memref<9x4x4xf32, #tpu.memory_space<vmem>>, vector<1x4x4xf32>
    %119 = vector.shape_cast %118 : vector<1x4x4xf32> to vector<4x4xf32>
    %cst_82 = arith.constant dense<0.000000e+00> : vector<4x256xf32>
    %120 = tpu.matmul %119, %86, %cst_82 {dimension_numbers = #tpu.dot_dimension_numbers<[1], [0], [0], [1], [0, 0, 1, 1], [], []>} : vector<4x4xf32>, vector<4x256xf32>, vector<4x256xf32> -> vector<4x256xf32>
    %121 = arith.addf %117, %120 : vector<4x256xf32>
    %c255_i32_83 = arith.constant 255 : i32
    %122 = tpu.dynamic_rotate %86 by %c255_i32_83 dim 1 : vector<4x256xf32>, i32 -> vector<4x256xf32>
    %c5_84 = arith.constant 5 : index
    %c0_85 = arith.constant 0 : index
    %123 = vector.load %arg2[%c5_84, %c0_85] : memref<9x256xf32, #tpu.memory_space<vmem>>, vector<1x256xf32>
    %124 = vector.broadcast %123 : vector<1x256xf32> to vector<4x256xf32>
    %125 = arith.mulf %122, %124 : vector<4x256xf32>
    %c5_86 = arith.constant 5 : index
    %c0_87 = arith.constant 0 : index
    %c0_88 = arith.constant 0 : index
    %126 = vector.load %arg4[%c5_86, %c0_87, %c0_88] : memref<9x4x4xf32, #tpu.memory_space<vmem>>, vector<1x4x4xf32>
    %127 = vector.shape_cast %126 : vector<1x4x4xf32> to vector<4x4xf32>
    %cst_89 = arith.constant dense<0.000000e+00> : vector<4x256xf32>
    %128 = tpu.matmul %127, %125, %cst_89 {dimension_numbers = #tpu.dot_dimension_numbers<[1], [0], [0], [1], [0, 0, 1, 1], [], []>} : vector<4x4xf32>, vector<4x256xf32>, vector<4x256xf32> -> vector<4x256xf32>
    %129 = arith.addf %121, %128 : vector<4x256xf32>
    %c241_i32_90 = arith.constant 241 : i32
    %130 = tpu.dynamic_rotate %86 by %c241_i32_90 dim 1 : vector<4x256xf32>, i32 -> vector<4x256xf32>
    %c6_91 = arith.constant 6 : index
    %c0_92 = arith.constant 0 : index
    %131 = vector.load %arg2[%c6_91, %c0_92] : memref<9x256xf32, #tpu.memory_space<vmem>>, vector<1x256xf32>
    %132 = vector.broadcast %131 : vector<1x256xf32> to vector<4x256xf32>
    %133 = arith.mulf %130, %132 : vector<4x256xf32>
    %c6_93 = arith.constant 6 : index
    %c0_94 = arith.constant 0 : index
    %c0_95 = arith.constant 0 : index
    %134 = vector.load %arg4[%c6_93, %c0_94, %c0_95] : memref<9x4x4xf32, #tpu.memory_space<vmem>>, vector<1x4x4xf32>
    %135 = vector.shape_cast %134 : vector<1x4x4xf32> to vector<4x4xf32>
    %cst_96 = arith.constant dense<0.000000e+00> : vector<4x256xf32>
    %136 = tpu.matmul %135, %133, %cst_96 {dimension_numbers = #tpu.dot_dimension_numbers<[1], [0], [0], [1], [0, 0, 1, 1], [], []>} : vector<4x4xf32>, vector<4x256xf32>, vector<4x256xf32> -> vector<4x256xf32>
    %137 = arith.addf %129, %136 : vector<4x256xf32>
    %c240_i32_97 = arith.constant 240 : i32
    %138 = tpu.dynamic_rotate %86 by %c240_i32_97 dim 1 : vector<4x256xf32>, i32 -> vector<4x256xf32>
    %c7_98 = arith.constant 7 : index
    %c0_99 = arith.constant 0 : index
    %139 = vector.load %arg2[%c7_98, %c0_99] : memref<9x256xf32, #tpu.memory_space<vmem>>, vector<1x256xf32>
    %140 = vector.broadcast %139 : vector<1x256xf32> to vector<4x256xf32>
    %141 = arith.mulf %138, %140 : vector<4x256xf32>
    %c7_100 = arith.constant 7 : index
    %c0_101 = arith.constant 0 : index
    %c0_102 = arith.constant 0 : index
    %142 = vector.load %arg4[%c7_100, %c0_101, %c0_102] : memref<9x4x4xf32, #tpu.memory_space<vmem>>, vector<1x4x4xf32>
    %143 = vector.shape_cast %142 : vector<1x4x4xf32> to vector<4x4xf32>
    %cst_103 = arith.constant dense<0.000000e+00> : vector<4x256xf32>
    %144 = tpu.matmul %143, %141, %cst_103 {dimension_numbers = #tpu.dot_dimension_numbers<[1], [0], [0], [1], [0, 0, 1, 1], [], []>} : vector<4x4xf32>, vector<4x256xf32>, vector<4x256xf32> -> vector<4x256xf32>
    %145 = arith.addf %137, %144 : vector<4x256xf32>
    %c239_i32_104 = arith.constant 239 : i32
    %146 = tpu.dynamic_rotate %86 by %c239_i32_104 dim 1 : vector<4x256xf32>, i32 -> vector<4x256xf32>
    %c8_105 = arith.constant 8 : index
    %c0_106 = arith.constant 0 : index
    %147 = vector.load %arg2[%c8_105, %c0_106] : memref<9x256xf32, #tpu.memory_space<vmem>>, vector<1x256xf32>
    %148 = vector.broadcast %147 : vector<1x256xf32> to vector<4x256xf32>
    %149 = arith.mulf %146, %148 : vector<4x256xf32>
    %c8_107 = arith.constant 8 : index
    %c0_108 = arith.constant 0 : index
    %c0_109 = arith.constant 0 : index
    %150 = vector.load %arg4[%c8_107, %c0_108, %c0_109] : memref<9x4x4xf32, #tpu.memory_space<vmem>>, vector<1x4x4xf32>
    %151 = vector.shape_cast %150 : vector<1x4x4xf32> to vector<4x4xf32>
    %cst_110 = arith.constant dense<0.000000e+00> : vector<4x256xf32>
    %152 = tpu.matmul %151, %149, %cst_110 {dimension_numbers = #tpu.dot_dimension_numbers<[1], [0], [0], [1], [0, 0, 1, 1], [], []>} : vector<4x4xf32>, vector<4x256xf32>, vector<4x256xf32> -> vector<4x256xf32>
    %153 = arith.addf %145, %152 : vector<4x256xf32>
    %cst_111 = arith.constant dense<0.000000e+00> : vector<4xf32>
    %154 = vector.multi_reduction <add>, %153, %cst_111 [1] : vector<4x256xf32> to vector<4xf32>
    %155 = vector.shape_cast %154 : vector<4xf32> to vector<4x1xf32>
    %cst_112 = arith.constant 3.906250e-03 : f32
    %156 = vector.broadcast %cst_112 : f32 to vector<4x1xf32>
    %157 = arith.mulf %155, %156 : vector<4x1xf32>
    %158 = vector.broadcast %157 : vector<4x1xf32> to vector<4x256xf32>
    %159 = arith.subf %153, %158 : vector<4x256xf32>
    %160 = arith.mulf %159, %159 : vector<4x256xf32>
    %cst_113 = arith.constant dense<0.000000e+00> : vector<4xf32>
    %161 = vector.multi_reduction <add>, %160, %cst_113 [1] : vector<4x256xf32> to vector<4xf32>
    %162 = vector.shape_cast %161 : vector<4xf32> to vector<4x1xf32>
    %cst_114 = arith.constant 3.906250e-03 : f32
    %163 = vector.broadcast %cst_114 : f32 to vector<4x1xf32>
    %164 = arith.mulf %162, %163 : vector<4x1xf32>
    %cst_115 = arith.constant 9.99999974E-6 : f32
    %165 = vector.broadcast %cst_115 : f32 to vector<4x1xf32>
    %166 = arith.addf %164, %165 : vector<4x1xf32>
    %167 = math.rsqrt %166 : vector<4x1xf32>
    %168 = vector.broadcast %167 : vector<4x1xf32> to vector<4x256xf32>
    %169 = arith.mulf %159, %168 : vector<4x256xf32>
    %170 = arith.addf %1, %169 : vector<4x256xf32>
    %c0_116 = arith.constant 0 : index
    %c0_117 = arith.constant 0 : index
    %c0_118 = arith.constant 0 : index
    %171 = vector.load %arg5[%c0_116, %c0_117, %c0_118] : memref<1x4x256xf32, #tpu.memory_space<vmem>>, vector<1x4x256xf32>
    %172 = vector.shape_cast %171 : vector<1x4x256xf32> to vector<4x256xf32>
    %173 = vector.shape_cast %170 : vector<4x256xf32> to vector<1x4x256xf32>
    tpu.vector_store %arg5[%c0_116, %c0_117, %c0_118], %173 {strides = array<i32>} : memref<1x4x256xf32, #tpu.memory_space<vmem>>, vector<1x4x256xf32>,
    return
  }
  func.func @transform_0(%arg0: i32) -> (i32, i32, i32) {
    %c0_i32 = arith.constant 0 : i32
    %c0_i32_0 = arith.constant 0 : i32
    %c0_i32_1 = arith.constant 0 : i32
    return %arg0, %c0_i32, %c0_i32_0 : i32, i32, i32
  }
  func.func @transform_1(%arg0: i32) -> (i32, i32) {
    %c0_i32 = arith.constant 0 : i32
    %c0_i32_0 = arith.constant 0 : i32
    %c0_i32_1 = arith.constant 0 : i32
    return %c0_i32, %c0_i32_0 : i32, i32
  }
  func.func @transform_2(%arg0: i32) -> (i32, i32, i32) {
    %c0_i32 = arith.constant 0 : i32
    %c0_i32_0 = arith.constant 0 : i32
    %c0_i32_1 = arith.constant 0 : i32
    %c0_i32_2 = arith.constant 0 : i32
    return %c0_i32, %c0_i32_0, %c0_i32_1 : i32, i32, i32
  }
  func.func @transform_3(%arg0: i32) -> (i32, i32, i32) {
    %c0_i32 = arith.constant 0 : i32
    %c0_i32_0 = arith.constant 0 : i32
    %c0_i32_1 = arith.constant 0 : i32
    %c0_i32_2 = arith.constant 0 : i32
    return %c0_i32, %c0_i32_0, %c0_i32_1 : i32, i32, i32
  }
  func.func @transform_4(%arg0: i32) -> (i32, i32, i32) {
    %c0_i32 = arith.constant 0 : i32
    %c0_i32_0 = arith.constant 0 : i32
    %c0_i32_1 = arith.constant 0 : i32
    return %arg0, %c0_i32, %c0_i32_0 : i32, i32, i32
  }
}

module attributes {stable_mosaic.version = 11 : i64} {
  func.func @residual_block_kernel(%arg0: i32, %arg1: memref<1x4x256xf32, #tpu.memory_space<vmem>>, %arg2: memref<9x256xf32, #tpu.memory_space<vmem>>, %arg3: memref<9x4x4xf32, #tpu.memory_space<vmem>>, %arg4: memref<9x4x4xf32, #tpu.memory_space<vmem>>, %arg5: memref<1x4x256xf32, #tpu.memory_space<vmem>>) attributes {dimension_semantics = [#tpu.dimension_semantics<parallel>], iteration_bounds = array<i64: 2>, scalar_prefetch = 0 : i64, scratch_operands = 0 : i64, tpu.core_type = #tpu.core_type<tc>, window_params = [{transform_indices = @transform_0, window_bounds = array<i64: 1, 4, 256>}, {pipeline_mode = #tpu.pipeline_mode<synchronous>, transform_indices = @transform_1, window_bounds = array<i64: 9, 256>}, {pipeline_mode = #tpu.pipeline_mode<synchronous>, transform_indices = @transform_2, window_bounds = array<i64: 9, 4, 4>}, {pipeline_mode = #tpu.pipeline_mode<synchronous>, transform_indices = @transform_3, window_bounds = array<i64: 9, 4, 4>}, {transform_indices = @transform_4, window_bounds = array<i64: 1, 4, 256>}]} {
    %c0 = arith.constant 0 : index
    %c0_0 = arith.constant 0 : index
    %c0_1 = arith.constant 0 : index
    %0 = vector.load %arg1[%c0, %c0_0, %c0_1] : memref<1x4x256xf32, #tpu.memory_space<vmem>>, vector<1x4x256xf32>
    %1 = vector.shape_cast %0 : vector<1x4x256xf32> to vector<4x256xf32>
    %c17_i32 = arith.constant 17 : i32
    %2 = tpu.dynamic_rotate %1 by %c17_i32 dim 1 : vector<4x256xf32>, i32 -> vector<4x256xf32>
    %c0_2 = arith.constant 0 : index
    %c0_3 = arith.constant 0 : index
    %3 = vector.load %arg2[%c0_2, %c0_3] : memref<9x256xf32, #tpu.memory_space<vmem>>, vector<1x256xf32>
    %4 = vector.broadcast %3 : vector<1x256xf32> to vector<4x256xf32>
    %5 = arith.mulf %2, %4 : vector<4x256xf32>
    %c0_4 = arith.constant 0 : index
    %c0_5 = arith.constant 0 : index
    %c0_6 = arith.constant 0 : index
    %6 = vector.load %arg3[%c0_4, %c0_5, %c0_6] : memref<9x4x4xf32, #tpu.memory_space<vmem>>, vector<1x4x4xf32>
    %7 = vector.shape_cast %6 : vector<1x4x4xf32> to vector<4x4xf32>
    %cst = arith.constant dense<0.000000e+00> : vector<4x256xf32>
    %8 = tpu.matmul %7, %5, %cst {dimension_numbers = #tpu.dot_dimension_numbers<[1], [0], [0], [1], [0, 0, 1, 1], [], []>} : vector<4x4xf32>, vector<4x256xf32>, vector<4x256xf32> -> vector<4x256xf32>
    %c16_i32 = arith.constant 16 : i32
    %9 = tpu.dynamic_rotate %1 by %c16_i32 dim 1 : vector<4x256xf32>, i32 -> vector<4x256xf32>
    %c1 = arith.constant 1 : index
    %c0_7 = arith.constant 0 : index
    %10 = vector.load %arg2[%c1, %c0_7] : memref<9x256xf32, #tpu.memory_space<vmem>>, vector<1x256xf32>
    %11 = vector.broadcast %10 : vector<1x256xf32> to vector<4x256xf32>
    %12 = arith.mulf %9, %11 : vector<4x256xf32>
    %c1_8 = arith.constant 1 : index
    %c0_9 = arith.constant 0 : index
    %c0_10 = arith.constant 0 : index
    %13 = vector.load %arg3[%c1_8, %c0_9, %c0_10] : memref<9x4x4xf32, #tpu.memory_space<vmem>>, vector<1x4x4xf32>
    %14 = vector.shape_cast %13 : vector<1x4x4xf32> to vector<4x4xf32>
    %cst_11 = arith.constant dense<0.000000e+00> : vector<4x256xf32>
    %15 = tpu.matmul %14, %12, %cst_11 {dimension_numbers = #tpu.dot_dimension_numbers<[1], [0], [0], [1], [0, 0, 1, 1], [], []>} : vector<4x4xf32>, vector<4x256xf32>, vector<4x256xf32> -> vector<4x256xf32>
    %16 = arith.addf %8, %15 : vector<4x256xf32>
    %c15_i32 = arith.constant 15 : i32
    %17 = tpu.dynamic_rotate %1 by %c15_i32 dim 1 : vector<4x256xf32>, i32 -> vector<4x256xf32>
    %c2 = arith.constant 2 : index
    %c0_12 = arith.constant 0 : index
    %18 = vector.load %arg2[%c2, %c0_12] : memref<9x256xf32, #tpu.memory_space<vmem>>, vector<1x256xf32>
    %19 = vector.broadcast %18 : vector<1x256xf32> to vector<4x256xf32>
    %20 = arith.mulf %17, %19 : vector<4x256xf32>
    %c2_13 = arith.constant 2 : index
    %c0_14 = arith.constant 0 : index
    %c0_15 = arith.constant 0 : index
    %21 = vector.load %arg3[%c2_13, %c0_14, %c0_15] : memref<9x4x4xf32, #tpu.memory_space<vmem>>, vector<1x4x4xf32>
    %22 = vector.shape_cast %21 : vector<1x4x4xf32> to vector<4x4xf32>
    %cst_16 = arith.constant dense<0.000000e+00> : vector<4x256xf32>
    %23 = tpu.matmul %22, %20, %cst_16 {dimension_numbers = #tpu.dot_dimension_numbers<[1], [0], [0], [1], [0, 0, 1, 1], [], []>} : vector<4x4xf32>, vector<4x256xf32>, vector<4x256xf32> -> vector<4x256xf32>
    %24 = arith.addf %16, %23 : vector<4x256xf32>
    %c1_i32 = arith.constant 1 : i32
    %25 = tpu.dynamic_rotate %1 by %c1_i32 dim 1 : vector<4x256xf32>, i32 -> vector<4x256xf32>
    %c3 = arith.constant 3 : index
    %c0_17 = arith.constant 0 : index
    %26 = vector.load %arg2[%c3, %c0_17] : memref<9x256xf32, #tpu.memory_space<vmem>>, vector<1x256xf32>
    %27 = vector.broadcast %26 : vector<1x256xf32> to vector<4x256xf32>
    %28 = arith.mulf %25, %27 : vector<4x256xf32>
    %c3_18 = arith.constant 3 : index
    %c0_19 = arith.constant 0 : index
    %c0_20 = arith.constant 0 : index
    %29 = vector.load %arg3[%c3_18, %c0_19, %c0_20] : memref<9x4x4xf32, #tpu.memory_space<vmem>>, vector<1x4x4xf32>
    %30 = vector.shape_cast %29 : vector<1x4x4xf32> to vector<4x4xf32>
    %cst_21 = arith.constant dense<0.000000e+00> : vector<4x256xf32>
    %31 = tpu.matmul %30, %28, %cst_21 {dimension_numbers = #tpu.dot_dimension_numbers<[1], [0], [0], [1], [0, 0, 1, 1], [], []>} : vector<4x4xf32>, vector<4x256xf32>, vector<4x256xf32> -> vector<4x256xf32>
    %32 = arith.addf %24, %31 : vector<4x256xf32>
    %c4 = arith.constant 4 : index
    %c0_22 = arith.constant 0 : index
    %c0_23 = arith.constant 0 : index
    %33 = vector.load %arg3[%c4, %c0_22, %c0_23] : memref<9x4x4xf32, #tpu.memory_space<vmem>>, vector<1x4x4xf32>
    %34 = vector.shape_cast %33 : vector<1x4x4xf32> to vector<4x4xf32>
    %cst_24 = arith.constant dense<0.000000e+00> : vector<4x256xf32>
    %35 = tpu.matmul %34, %1, %cst_24 {dimension_numbers = #tpu.dot_dimension_numbers<[1], [0], [0], [1], [0, 0, 1, 1], [], []>} : vector<4x4xf32>, vector<4x256xf32>, vector<4x256xf32> -> vector<4x256xf32>
    %36 = arith.addf %32, %35 : vector<4x256xf32>
    %c255_i32 = arith.constant 255 : i32
    %37 = tpu.dynamic_rotate %1 by %c255_i32 dim 1 : vector<4x256xf32>, i32 -> vector<4x256xf32>
    %c5 = arith.constant 5 : index
    %c0_25 = arith.constant 0 : index
    %38 = vector.load %arg2[%c5, %c0_25] : memref<9x256xf32, #tpu.memory_space<vmem>>, vector<1x256xf32>
    %39 = vector.broadcast %38 : vector<1x256xf32> to vector<4x256xf32>
    %40 = arith.mulf %37, %39 : vector<4x256xf32>
    %c5_26 = arith.constant 5 : index
    %c0_27 = arith.constant 0 : index
    %c0_28 = arith.constant 0 : index
    %41 = vector.load %arg3[%c5_26, %c0_27, %c0_28] : memref<9x4x4xf32, #tpu.memory_space<vmem>>, vector<1x4x4xf32>
    %42 = vector.shape_cast %41 : vector<1x4x4xf32> to vector<4x4xf32>
    %cst_29 = arith.constant dense<0.000000e+00> : vector<4x256xf32>
    %43 = tpu.matmul %42, %40, %cst_29 {dimension_numbers = #tpu.dot_dimension_numbers<[1], [0], [0], [1], [0, 0, 1, 1], [], []>} : vector<4x4xf32>, vector<4x256xf32>, vector<4x256xf32> -> vector<4x256xf32>
    %44 = arith.addf %36, %43 : vector<4x256xf32>
    %c241_i32 = arith.constant 241 : i32
    %45 = tpu.dynamic_rotate %1 by %c241_i32 dim 1 : vector<4x256xf32>, i32 -> vector<4x256xf32>
    %c6 = arith.constant 6 : index
    %c0_30 = arith.constant 0 : index
    %46 = vector.load %arg2[%c6, %c0_30] : memref<9x256xf32, #tpu.memory_space<vmem>>, vector<1x256xf32>
    %47 = vector.broadcast %46 : vector<1x256xf32> to vector<4x256xf32>
    %48 = arith.mulf %45, %47 : vector<4x256xf32>
    %c6_31 = arith.constant 6 : index
    %c0_32 = arith.constant 0 : index
    %c0_33 = arith.constant 0 : index
    %49 = vector.load %arg3[%c6_31, %c0_32, %c0_33] : memref<9x4x4xf32, #tpu.memory_space<vmem>>, vector<1x4x4xf32>
    %50 = vector.shape_cast %49 : vector<1x4x4xf32> to vector<4x4xf32>
    %cst_34 = arith.constant dense<0.000000e+00> : vector<4x256xf32>
    %51 = tpu.matmul %50, %48, %cst_34 {dimension_numbers = #tpu.dot_dimension_numbers<[1], [0], [0], [1], [0, 0, 1, 1], [], []>} : vector<4x4xf32>, vector<4x256xf32>, vector<4x256xf32> -> vector<4x256xf32>
    %52 = arith.addf %44, %51 : vector<4x256xf32>
    %c240_i32 = arith.constant 240 : i32
    %53 = tpu.dynamic_rotate %1 by %c240_i32 dim 1 : vector<4x256xf32>, i32 -> vector<4x256xf32>
    %c7 = arith.constant 7 : index
    %c0_35 = arith.constant 0 : index
    %54 = vector.load %arg2[%c7, %c0_35] : memref<9x256xf32, #tpu.memory_space<vmem>>, vector<1x256xf32>
    %55 = vector.broadcast %54 : vector<1x256xf32> to vector<4x256xf32>
    %56 = arith.mulf %53, %55 : vector<4x256xf32>
    %c7_36 = arith.constant 7 : index
    %c0_37 = arith.constant 0 : index
    %c0_38 = arith.constant 0 : index
    %57 = vector.load %arg3[%c7_36, %c0_37, %c0_38] : memref<9x4x4xf32, #tpu.memory_space<vmem>>, vector<1x4x4xf32>
    %58 = vector.shape_cast %57 : vector<1x4x4xf32> to vector<4x4xf32>
    %cst_39 = arith.constant dense<0.000000e+00> : vector<4x256xf32>
    %59 = tpu.matmul %58, %56, %cst_39 {dimension_numbers = #tpu.dot_dimension_numbers<[1], [0], [0], [1], [0, 0, 1, 1], [], []>} : vector<4x4xf32>, vector<4x256xf32>, vector<4x256xf32> -> vector<4x256xf32>
    %60 = arith.addf %52, %59 : vector<4x256xf32>
    %c239_i32 = arith.constant 239 : i32
    %61 = tpu.dynamic_rotate %1 by %c239_i32 dim 1 : vector<4x256xf32>, i32 -> vector<4x256xf32>
    %c8 = arith.constant 8 : index
    %c0_40 = arith.constant 0 : index
    %62 = vector.load %arg2[%c8, %c0_40] : memref<9x256xf32, #tpu.memory_space<vmem>>, vector<1x256xf32>
    %63 = vector.broadcast %62 : vector<1x256xf32> to vector<4x256xf32>
    %64 = arith.mulf %61, %63 : vector<4x256xf32>
    %c8_41 = arith.constant 8 : index
    %c0_42 = arith.constant 0 : index
    %c0_43 = arith.constant 0 : index
    %65 = vector.load %arg3[%c8_41, %c0_42, %c0_43] : memref<9x4x4xf32, #tpu.memory_space<vmem>>, vector<1x4x4xf32>
    %66 = vector.shape_cast %65 : vector<1x4x4xf32> to vector<4x4xf32>
    %cst_44 = arith.constant dense<0.000000e+00> : vector<4x256xf32>
    %67 = tpu.matmul %66, %64, %cst_44 {dimension_numbers = #tpu.dot_dimension_numbers<[1], [0], [0], [1], [0, 0, 1, 1], [], []>} : vector<4x4xf32>, vector<4x256xf32>, vector<4x256xf32> -> vector<4x256xf32>
    %68 = arith.addf %60, %67 : vector<4x256xf32>
    %cst_45 = arith.constant dense<0.000000e+00> : vector<4xf32>
    %69 = vector.multi_reduction <add>, %68, %cst_45 [1] : vector<4x256xf32> to vector<4xf32>
    %70 = vector.shape_cast %69 : vector<4xf32> to vector<4x1xf32>
    %cst_46 = arith.constant 3.906250e-03 : f32
    %71 = vector.broadcast %cst_46 : f32 to vector<4x1xf32>
    %72 = arith.mulf %70, %71 : vector<4x1xf32>
    %73 = vector.broadcast %72 : vector<4x1xf32> to vector<4x256xf32>
    %74 = arith.subf %68, %73 : vector<4x256xf32>
    %75 = arith.mulf %74, %74 : vector<4x256xf32>
    %cst_47 = arith.constant dense<0.000000e+00> : vector<4xf32>
    %76 = vector.multi_reduction <add>, %75, %cst_47 [1] : vector<4x256xf32> to vector<4xf32>
    %77 = vector.shape_cast %76 : vector<4xf32> to vector<4x1xf32>
    %cst_48 = arith.constant 3.906250e-03 : f32
    %78 = vector.broadcast %cst_48 : f32 to vector<4x1xf32>
    %79 = arith.mulf %77, %78 : vector<4x1xf32>
    %cst_49 = arith.constant 9.99999974E-6 : f32
    %80 = vector.broadcast %cst_49 : f32 to vector<4x1xf32>
    %81 = arith.addf %79, %80 : vector<4x1xf32>
    %82 = math.rsqrt %81 : vector<4x1xf32>
    %83 = vector.broadcast %82 : vector<4x1xf32> to vector<4x256xf32>
    %84 = arith.mulf %74, %83 : vector<4x256xf32>
    %cst_50 = arith.constant 0.000000e+00 : f32
    %85 = vector.broadcast %cst_50 : f32 to vector<4x256xf32>
    %86 = arith.maximumf %84, %85 : vector<4x256xf32>
    %c17_i32_51 = arith.constant 17 : i32
    %87 = tpu.dynamic_rotate %86 by %c17_i32_51 dim 1 : vector<4x256xf32>, i32 -> vector<4x256xf32>
    %c0_52 = arith.constant 0 : index
    %c0_53 = arith.constant 0 : index
    %88 = vector.load %arg2[%c0_52, %c0_53] : memref<9x256xf32, #tpu.memory_space<vmem>>, vector<1x256xf32>
    %89 = vector.broadcast %88 : vector<1x256xf32> to vector<4x256xf32>
    %90 = arith.mulf %87, %89 : vector<4x256xf32>
    %c0_54 = arith.constant 0 : index
    %c0_55 = arith.constant 0 : index
    %c0_56 = arith.constant 0 : index
    %91 = vector.load %arg4[%c0_54, %c0_55, %c0_56] : memref<9x4x4xf32, #tpu.memory_space<vmem>>, vector<1x4x4xf32>
    %92 = vector.shape_cast %91 : vector<1x4x4xf32> to vector<4x4xf32>
    %cst_57 = arith.constant dense<0.000000e+00> : vector<4x256xf32>
    %93 = tpu.matmul %92, %90, %cst_57 {dimension_numbers = #tpu.dot_dimension_numbers<[1], [0], [0], [1], [0, 0, 1, 1], [], []>} : vector<4x4xf32>, vector<4x256xf32>, vector<4x256xf32> -> vector<4x256xf32>
    %c16_i32_58 = arith.constant 16 : i32
    %94 = tpu.dynamic_rotate %86 by %c16_i32_58 dim 1 : vector<4x256xf32>, i32 -> vector<4x256xf32>
    %c1_59 = arith.constant 1 : index
    %c0_60 = arith.constant 0 : index
    %95 = vector.load %arg2[%c1_59, %c0_60] : memref<9x256xf32, #tpu.memory_space<vmem>>, vector<1x256xf32>
    %96 = vector.broadcast %95 : vector<1x256xf32> to vector<4x256xf32>
    %97 = arith.mulf %94, %96 : vector<4x256xf32>
    %c1_61 = arith.constant 1 : index
    %c0_62 = arith.constant 0 : index
    %c0_63 = arith.constant 0 : index
    %98 = vector.load %arg4[%c1_61, %c0_62, %c0_63] : memref<9x4x4xf32, #tpu.memory_space<vmem>>, vector<1x4x4xf32>
    %99 = vector.shape_cast %98 : vector<1x4x4xf32> to vector<4x4xf32>
    %cst_64 = arith.constant dense<0.000000e+00> : vector<4x256xf32>
    %100 = tpu.matmul %99, %97, %cst_64 {dimension_numbers = #tpu.dot_dimension_numbers<[1], [0], [0], [1], [0, 0, 1, 1], [], []>} : vector<4x4xf32>, vector<4x256xf32>, vector<4x256xf32> -> vector<4x256xf32>
    %101 = arith.addf %93, %100 : vector<4x256xf32>
    %c15_i32_65 = arith.constant 15 : i32
    %102 = tpu.dynamic_rotate %86 by %c15_i32_65 dim 1 : vector<4x256xf32>, i32 -> vector<4x256xf32>
    %c2_66 = arith.constant 2 : index
    %c0_67 = arith.constant 0 : index
    %103 = vector.load %arg2[%c2_66, %c0_67] : memref<9x256xf32, #tpu.memory_space<vmem>>, vector<1x256xf32>
    %104 = vector.broadcast %103 : vector<1x256xf32> to vector<4x256xf32>
    %105 = arith.mulf %102, %104 : vector<4x256xf32>
    %c2_68 = arith.constant 2 : index
    %c0_69 = arith.constant 0 : index
    %c0_70 = arith.constant 0 : index
    %106 = vector.load %arg4[%c2_68, %c0_69, %c0_70] : memref<9x4x4xf32, #tpu.memory_space<vmem>>, vector<1x4x4xf32>
    %107 = vector.shape_cast %106 : vector<1x4x4xf32> to vector<4x4xf32>
    %cst_71 = arith.constant dense<0.000000e+00> : vector<4x256xf32>
    %108 = tpu.matmul %107, %105, %cst_71 {dimension_numbers = #tpu.dot_dimension_numbers<[1], [0], [0], [1], [0, 0, 1, 1], [], []>} : vector<4x4xf32>, vector<4x256xf32>, vector<4x256xf32> -> vector<4x256xf32>
    %109 = arith.addf %101, %108 : vector<4x256xf32>
    %c1_i32_72 = arith.constant 1 : i32
    %110 = tpu.dynamic_rotate %86 by %c1_i32_72 dim 1 : vector<4x256xf32>, i32 -> vector<4x256xf32>
    %c3_73 = arith.constant 3 : index
    %c0_74 = arith.constant 0 : index
    %111 = vector.load %arg2[%c3_73, %c0_74] : memref<9x256xf32, #tpu.memory_space<vmem>>, vector<1x256xf32>
    %112 = vector.broadcast %111 : vector<1x256xf32> to vector<4x256xf32>
    %113 = arith.mulf %110, %112 : vector<4x256xf32>
    %c3_75 = arith.constant 3 : index
    %c0_76 = arith.constant 0 : index
    %c0_77 = arith.constant 0 : index
    %114 = vector.load %arg4[%c3_75, %c0_76, %c0_77] : memref<9x4x4xf32, #tpu.memory_space<vmem>>, vector<1x4x4xf32>
    %115 = vector.shape_cast %114 : vector<1x4x4xf32> to vector<4x4xf32>
    %cst_78 = arith.constant dense<0.000000e+00> : vector<4x256xf32>
    %116 = tpu.matmul %115, %113, %cst_78 {dimension_numbers = #tpu.dot_dimension_numbers<[1], [0], [0], [1], [0, 0, 1, 1], [], []>} : vector<4x4xf32>, vector<4x256xf32>, vector<4x256xf32> -> vector<4x256xf32>
    %117 = arith.addf %109, %116 : vector<4x256xf32>
    %c4_79 = arith.constant 4 : index
    %c0_80 = arith.constant 0 : index
    %c0_81 = arith.constant 0 : index
    %118 = vector.load %arg4[%c4_79, %c0_80, %c0_81] : memref<9x4x4xf32, #tpu.memory_space<vmem>>, vector<1x4x4xf32>
    %119 = vector.shape_cast %118 : vector<1x4x4xf32> to vector<4x4xf32>
    %cst_82 = arith.constant dense<0.000000e+00> : vector<4x256xf32>
    %120 = tpu.matmul %119, %86, %cst_82 {dimension_numbers = #tpu.dot_dimension_numbers<[1], [0], [0], [1], [0, 0, 1, 1], [], []>} : vector<4x4xf32>, vector<4x256xf32>, vector<4x256xf32> -> vector<4x256xf32>
    %121 = arith.addf %117, %120 : vector<4x256xf32>
    %c255_i32_83 = arith.constant 255 : i32
    %122 = tpu.dynamic_rotate %86 by %c255_i32_83 dim 1 : vector<4x256xf32>, i32 -> vector<4x256xf32>
    %c5_84 = arith.constant 5 : index
    %c0_85 = arith.constant 0 : index
    %123 = vector.load %arg2[%c5_84, %c0_85] : memref<9x256xf32, #tpu.memory_space<vmem>>, vector<1x256xf32>
    %124 = vector.broadcast %123 : vector<1x256xf32> to vector<4x256xf32>
    %125 = arith.mulf %122, %124 : vector<4x256xf32>
    %c5_86 = arith.constant 5 : index
    %c0_87 = arith.constant 0 : index
    %c0_88 = arith.constant 0 : index
    %126 = vector.load %arg4[%c5_86, %c0_87, %c0_88] : memref<9x4x4xf32, #tpu.memory_space<vmem>>, vector<1x4x4xf32>
    %127 = vector.shape_cast %126 : vector<1x4x4xf32> to vector<4x4xf32>
    %cst_89 = arith.constant dense<0.000000e+00> : vector<4x256xf32>
    %128 = tpu.matmul %127, %125, %cst_89 {dimension_numbers = #tpu.dot_dimension_numbers<[1], [0], [0], [1], [0, 0, 1, 1], [], []>} : vector<4x4xf32>, vector<4x256xf32>, vector<4x256xf32> -> vector<4x256xf32>
    %129 = arith.addf %121, %128 : vector<4x256xf32>
    %c241_i32_90 = arith.constant 241 : i32
    %130 = tpu.dynamic_rotate %86 by %c241_i32_90 dim 1 : vector<4x256xf32>, i32 -> vector<4x256xf32>
    %c6_91 = arith.constant 6 : index
    %c0_92 = arith.constant 0 : index
    %131 = vector.load %arg2[%c6_91, %c0_92] : memref<9x256xf32, #tpu.memory_space<vmem>>, vector<1x256xf32>
    %132 = vector.broadcast %131 : vector<1x256xf32> to vector<4x256xf32>
    %133 = arith.mulf %130, %132 : vector<4x256xf32>
    %c6_93 = arith.constant 6 : index
    %c0_94 = arith.constant 0 : index
    %c0_95 = arith.constant 0 : index
    %134 = vector.load %arg4[%c6_93, %c0_94, %c0_95] : memref<9x4x4xf32, #tpu.memory_space<vmem>>, vector<1x4x4xf32>
    %135 = vector.shape_cast %134 : vector<1x4x4xf32> to vector<4x4xf32>
    %cst_96 = arith.constant dense<0.000000e+00> : vector<4x256xf32>
    %136 = tpu.matmul %135, %133, %cst_96 {dimension_numbers = #tpu.dot_dimension_numbers<[1], [0], [0], [1], [0, 0, 1, 1], [], []>} : vector<4x4xf32>, vector<4x256xf32>, vector<4x256xf32> -> vector<4x256xf32>
    %137 = arith.addf %129, %136 : vector<4x256xf32>
    %c240_i32_97 = arith.constant 240 : i32
    %138 = tpu.dynamic_rotate %86 by %c240_i32_97 dim 1 : vector<4x256xf32>, i32 -> vector<4x256xf32>
    %c7_98 = arith.constant 7 : index
    %c0_99 = arith.constant 0 : index
    %139 = vector.load %arg2[%c7_98, %c0_99] : memref<9x256xf32, #tpu.memory_space<vmem>>, vector<1x256xf32>
    %140 = vector.broadcast %139 : vector<1x256xf32> to vector<4x256xf32>
    %141 = arith.mulf %138, %140 : vector<4x256xf32>
    %c7_100 = arith.constant 7 : index
    %c0_101 = arith.constant 0 : index
    %c0_102 = arith.constant 0 : index
    %142 = vector.load %arg4[%c7_100, %c0_101, %c0_102] : memref<9x4x4xf32, #tpu.memory_space<vmem>>, vector<1x4x4xf32>
    %143 = vector.shape_cast %142 : vector<1x4x4xf32> to vector<4x4xf32>
    %cst_103 = arith.constant dense<0.000000e+00> : vector<4x256xf32>
    %144 = tpu.matmul %143, %141, %cst_103 {dimension_numbers = #tpu.dot_dimension_numbers<[1], [0], [0], [1], [0, 0, 1, 1], [], []>} : vector<4x4xf32>, vector<4x256xf32>, vector<4x256xf32> -> vector<4x256xf32>
    %145 = arith.addf %137, %144 : vector<4x256xf32>
    %c239_i32_104 = arith.constant 239 : i32
    %146 = tpu.dynamic_rotate %86 by %c239_i32_104 dim 1 : vector<4x256xf32>, i32 -> vector<4x256xf32>
    %c8_105 = arith.constant 8 : index
    %c0_106 = arith.constant 0 : index
    %147 = vector.load %arg2[%c8_105, %c0_106] : memref<9x256xf32, #tpu.memory_space<vmem>>, vector<1x256xf32>
    %148 = vector.broadcast %147 : vector<1x256xf32> to vector<4x256xf32>
    %149 = arith.mulf %146, %148 : vector<4x256xf32>
    %c8_107 = arith.constant 8 : index
    %c0_108 = arith.constant 0 : index
    %c0_109 = arith.constant 0 : index
    %150 = vector.load %arg4[%c8_107, %c0_108, %c0_109] : memref<9x4x4xf32, #tpu.memory_space<vmem>>, vector<1x4x4xf32>
    %151 = vector.shape_cast %150 : vector<1x4x4xf32> to vector<4x4xf32>
    %cst_110 = arith.constant dense<0.000000e+00> : vector<4x256xf32>
    %152 = tpu.matmul %151, %149, %cst_110 {dimension_numbers = #tpu.dot_dimension_numbers<[1], [0], [0], [1], [0, 0, 1, 1], [], []>} : vector<4x4xf32>, vector<4x256xf32>, vector<4x256xf32> -> vector<4x256xf32>
    %153 = arith.addf %145, %152 : vector<4x256xf32>
    %cst_111 = arith.constant dense<0.000000e+00> : vector<4xf32>
    %154 = vector.multi_reduction <add>, %153, %cst_111 [1] : vector<4x256xf32> to vector<4xf32>
    %155 = vector.shape_cast %154 : vector<4xf32> to vector<4x1xf32>
    %cst_112 = arith.constant 3.906250e-03 : f32
    %156 = vector.broadcast %cst_112 : f32 to vector<4x1xf32>
    %157 = arith.mulf %155, %156 : vector<4x1xf32>
    %158 = vector.broadcast %157 : vector<4x1xf32> to vector<4x256xf32>
    %159 = arith.subf %153, %158 : vector<4x256xf32>
    %160 = arith.mulf %159, %159 : vector<4x256xf32>
    %cst_113 = arith.constant dense<0.000000e+00> : vector<4xf32>
    %161 = vector.multi_reduction <add>, %160, %cst_113 [1] : vector<4x256xf32> to vector<4xf32>
    %162 = vector.shape_cast %161 : vector<4xf32> to vector<4x1xf32>
    %cst_114 = arith.constant 3.906250e-03 : f32
    %163 = vector.broadcast %cst_114 : f32 to vector<4x1xf32>
    %164 = arith.mulf %162, %163 : vector<4x1xf32>
    %cst_115 = arith.constant 9.99999974E-6 : f32
    %165 = vector.broadcast %cst_115 : f32 to vector<4x1xf32>
    %166 = arith.addf %164, %165 : vector<4x1xf32>
    %167 = math.rsqrt %166 : vector<4x1xf32>
    %168 = vector.broadcast %167 : vector<4x1xf32> to vector<4x256xf32>
    %169 = arith.mulf %159, %168 : vector<4x256xf32>
    %170 = arith.addf %1, %169 : vector<4x256xf32>
    %c0_116 = arith.constant 0 : index
    %c0_117 = arith.constant 0 : index
    %c0_118 = arith.constant 0 : index
    %171 = vector.load %arg5[%c0_116, %c0_117, %c0_118] : memref<1x4x256xf32, #tpu.memory_space<vmem>>, vector<1x4x256xf32>
    %172 = vector.shape_cast %171 : vector<1x4x256xf32> to vector<4x256xf32>
    %173 = vector.shape_cast %170 : vector<4x256xf32> to vector<1x4x256xf32>
    tpu.vector_store %arg5[%c0_116, %c0_117, %c0_118], %173 {strides = array<i32>} : memref<1x4x256xf32, #tpu.memory_space<vmem>>, vector<1x4x256xf32>,
    return
  }
  func.func @transform_0(%arg0: i32) -> (i32, i32, i32) {
    %c0_i32 = arith.constant 0 : i32
    %c0_i32_0 = arith.constant 0 : i32
    %c0_i32_1 = arith.constant 0 : i32
    return %arg0, %c0_i32, %c0_i32_0 : i32, i32, i32
  }
  func.func @transform_1(%arg0: i32) -> (i32, i32) {
    %c0_i32 = arith.constant 0 : i32
    %c0_i32_0 = arith.constant 0 : i32
    %c0_i32_1 = arith.constant 0 : i32
    return %c0_i32, %c0_i32_0 : i32, i32
  }
  func.func @transform_2(%arg0: i32) -> (i32, i32, i32) {
    %c0_i32 = arith.constant 0 : i32
    %c0_i32_0 = arith.constant 0 : i32
    %c0_i32_1 = arith.constant 0 : i32
    %c0_i32_2 = arith.constant 0 : i32
    return %c0_i32, %c0_i32_0, %c0_i32_1 : i32, i32, i32
  }
  func.func @transform_3(%arg0: i32) -> (i32, i32, i32) {
    %c0_i32 = arith.constant 0 : i32
    %c0_i32_0 = arith.constant 0 : i32
    %c0_i32_1 = arith.constant 0 : i32
    %c0_i32_2 = arith.constant 0 : i32
    return %c0_i32, %c0_i32_0, %c0_i32_1 : i32, i32, i32
  }
  func.func @transform_4(%arg0: i32) -> (i32, i32, i32) {
    %c0_i32 = arith.constant 0 : i32
    %c0_i32_0 = arith.constant 0 : i32
    %c0_i32_1 = arith.constant 0 : i32
    return %arg0, %c0_i32, %c0_i32_0 : i32, i32, i32
  }
}

</mosaic_0001>

<bundles_post_ra>
// kernel: tpu_custom_call.1
= control target key start
LH: loop header
LB: loop body
LE: loop exit
PB: predicated region body
PF: predicated region fallthrough
CT: control target
= control target key end

     0   :  { %9 = vsyncpa [#allocation3], 0  ;;  %s2766_s0 = inlined_call_operand.vmem [shape: f32[2,4,256], index: 0, kind: input, shape index: {}]   ;;  %s2767_s1 = inlined_call_operand.vmem [shape: f32[9,256], index: 1, kind: input, shape index: {}]   ;;  %s2768_s2 = inlined_call_operand.vmem [shape: f32[9,4,4], index: 2, kind: input, shape index: {}]   ;;  %s2769_s3 = inlined_call_operand.vmem [shape: f32[9,4,4], index: 3, kind: input, shape index: {}]   ;;  %s2770_s4 = inlined_call_operand.hbm [shape: f32[2,4,256], index: 4, kind: output, shape index: {}]  }
   0x1   :  { %11 = vsyncpa [#allocation3 + $0x1], 0  ;;  %s2306_s15 = smov 0   ;;  %s2308_s16 = smov 0  }
   0x2   :  { %s2310_s17 = smov 0   ;;  %s2312_s18 = smov 0  }
   0x3 LB: > { %s2327_s19 = sadd.s32 4294967295, %s2269_s18   ;;  %s2065_s20 = sadd.s32 4294967294, %s2269_s18   ;;  %s2269_s18 = sphi %s2312_s18, %s2776_s18   ;;  %s2265_s17 = sphi %s2310_s17, %s2775_s17   ;;  %s2261_s16 = sphi %s2308_s16, %s2774_s16   ;;  %s2257_s15 = sphi %s2306_s15, %s2773_s15  }
   0x4   : > { %s2331_s21 = sadd.s32 1, %s2269_s18   ;;  %s113_s22 = sadd.s32 1, %s2265_s17 }
   0x5   : > { %s110_s23 = ssub.s32 %s2269_s18, %s2331_s21  ;;  %p123_p0 = scmp.ne.s32.totalorder %s2265_s17, %s2261_s16 }
   0x6   : > { %p111_p1 = scmp.eq.s32.totalorder %s110_s23, 0  ;;  %p124_p2 = scmp.eq.s32.totalorder %s2327_s19, 1 }
   0x7   : > { %p129_p3 = scmp.ne.s32.totalorder %s2261_s16, %s2257_s15  ;;  %p130_p4 = scmp.eq.s32.totalorder %s2065_s20, 1 }
   0x8   : > { %s2342_s24 = scalar_select %p111_p1, %s2265_s17, %s113_s22  }
   0x9   : > { %p2344_p5 = por %p124_p2, %p123_p0  ;;  %p2348_p6 = por %p130_p4, %p129_p3 }
   0xa   : > { %p2068_p7 = scmp.ge.s32.totalorder %s2269_s18, 1  ;;  %p165_p8 = scmp.lt.s32.totalorder %s2269_s18, 3 }
   0xc   : > { %p166_p9 = pnand %p2068_p7, %p165_p8 }
   0xd   : > { %p191_p10 = scmp.lt.s32.totalorder (!%p166_p9), %s2327_s19, 1  ;;  %s2271_s6 = smov (!%p166_p9), 17  }
   0xe   : > { %169 = sbr.rel (%p166_p9) target bundleno = 1349 (0x545), region = 36  ;;  %s2272_s7 = smov (!%p166_p9), 16  }
   0xf   : > { %s2274_s8 = smov (!%p166_p9), 15   ;;  %s2275_s9 = smov (!%p166_p9), 1  }
  0x10   : > { %s2276_s10 = smov (!%p166_p9), 127   ;;  %s2277_s11 = smov (!%p166_p9), 113  }
  0x11   : > { %s2278_s12 = smov (!%p166_p9), 112   ;;  %s2279_s13 = smov (!%p166_p9), 111  }
  0x12   : > { %s2280_s20 = smov (!%p166_p9), [#allocation2]  }
  0x13   : > { %s192_s27 = scalar_select %p191_p10, %s2327_s19, 1  ;;  %v2273_v2 = vmov 0.0   ;;  %v204_v3 = vlaneseq  ;;  %v209_v8 = vld [vmem:[%s2767_s1] ss:$8 sm:$0x3]  ;;  %vm252_vm1 = vcmask 1043456  }
  0x14   : > { %323 = vmatprep.mubr.f32.mxu0 %v2273_v2  ;;  %403 = vmatprep.mubr.f32.mxu1 %v2273_v2  ;;  %v2072_v13 = vld [vmem:[%s2767_s1 + $0x1] ss:$8 sm:$0x3]  ;;  %v2080_v16 = vld [vmem:[%s2767_s1 + $0x2] ss:$8 sm:$0x3] }
  0x15   : > { %s2154_s28 = sshll.u32 %s192_s27, 3  ;;  %v212_v4 = vshrl.u32 %v204_v3, 7  ;;  %v2399_v5 = vand.u32 127, %v204_v3  ;;  %v2085_v19 = vld [vmem:[%s2767_s1 + $0x3] ss:$8 sm:$0x3] }
  0x16   : > { %s195_s5 = scalar_lea.vmem %s2766_s0, %s2154_s28  ;;  %v223_v24 = vld [vmem:[%s2768_s2] sm:$0xf]  ;;  %vm248_vm5 = vcmask 31744   ;;  %v2094_v37 = vld [vmem:[%s2767_s1 + $0x5] ss:$8 sm:$0x3] }
  0x17   : > { %v2359_v0 = vld [vmem:[%s195_s5] sm:$0xff]  ;;  %v2401_v6 = vsub.s32 0, %v212_v4  ;;  %v2403_v7 = vsub.s32 1, %v212_v4  ;;  %vm206_vm0 = vcmp.lt.s32.totalorder %v2399_v5, 17  ;;  %vm414_vm2 = vcmp.lt.s32.totalorder %v2399_v5, 15  ;;  %s2213_s22 = sshll.u32 %s2280_s20, 4  ;;  %s2214_s22 = int_to_ptr.vmem [resolvable:$false] %s2213_s22 }
  0x18   : > { %200 = vrot.lane.b32.xlu1 %v2359_v0, %s2271_s6  ;;  %224 = vrot.lane.b32.xlu0 %v2359_v0, %s2272_s7  ;;  %v2367_v1 = vcombine.high %v2359_v0, %v2359_v0  ;;  %vm228_vm3 = vcmp.lt.s32.totalorder %v2399_v5, 16  ;;  %vm520_vm4 = vcmp.lt.s32.totalorder %v2399_v5, 1  ;;  %v2073_v38 = vld [vmem:[%s2768_s2 + $0x4] sm:$0xf]  ;;  %vm708_vm6 = vcmp.lt.s32.totalorder %v2399_v5, 127 }
  0x19   : > { %v2410_v11 = vrot.slane %v209_v8, %v2401_v6  ;;  %v2413_v12 = vrot.slane %v209_v8, %v2403_v7  ;;  %v2433_v22 = vrot.slane %v2072_v13, %v2401_v6  ;;  %v2436_v23 = vrot.slane %v2072_v13, %v2403_v7  ;;  %v2099_v49 = vld [vmem:[%s2767_s1 + $0x6] ss:$8 sm:$0x3]  ;;  %v2081_v50 = vld [vmem:[%s2768_s2 + $0x8] sm:$0xf] }
  0x1a   : > { %v2443_v25 = vrot.slane %v2080_v16, %v2401_v6  ;;  %v2446_v26 = vrot.slane %v2080_v16, %v2403_v7  ;;  %v2450_v29 = vrot.slane %v2085_v19, %v2401_v6  ;;  %v2464_v36 = vrot.slane %v2085_v19, %v2403_v7  ;;  %v2086_v51 = vld [vmem:[%s2768_s2 + $0xc] sm:$0xf]  ;;  %v2090_v61 = vld [vmem:[%s2768_s2 + $0x10] sm:$0xf]  ;;  %v2095_v62 = vld [vmem:[%s2768_s2 + $0x14] sm:$0xf] }
  0x1b   : > { %v2483_v45 = vrot.slane %v2094_v37, %v2401_v6  ;;  %v2491_v48 = vrot.slane %v2094_v37, %v2403_v7  ;;  %v2513_v56 = vrot.slane %v2099_v49, %v2401_v6  ;;  %vm814_vm7 = vcmp.lt.s32.totalorder %v2399_v5, 113  ;;  %v2104_v60 = vld [vmem:[%s2767_s1 + $0x7] ss:$8 sm:$0x3] }
  0x1c   : > { %410 = vrot.lane.b32.xlu0 %v2359_v0, %s2274_s8  ;;  %202 = vrot.lane.b32.xlu1 %v2367_v1, %s2271_s6  ;;  %v2521_v59 = vrot.slane %v2099_v49, %v2403_v7  ;;  %v2543_v8 = vrot.slane %v2104_v60, %v2401_v6  ;;  %vm920_vm8 = vcmp.lt.s32.totalorder %v2399_v5, 112  ;;  %v2551_v13 = vrot.slane %v2104_v60, %v2403_v7 }
  0x1d   : > { %vm1026_vm9 = vcmp.lt.s32.totalorder %v2399_v5, 111 }
  0x20   : > { %412 = vrot.lane.b32.xlu1 %v2367_v1, %s2274_s8  ;;  %226 = vrot.lane.b32.xlu0 %v2367_v1, %s2272_s7 }
  0x24   : > { %518 = vrot.lane.b32.xlu1 %v2367_v1, %s2275_s9  ;;  %516 = vrot.lane.b32.xlu0 %v2359_v0, %s2275_s9 }
  0x28   : > { %706 = vrot.lane.b32.xlu1 %v2367_v1, %s2276_s10  ;;  %704 = vrot.lane.b32.xlu0 %v2359_v0, %s2276_s10 }
  0x2c   : > { %812 = vrot.lane.b32.xlu1 %v2367_v1, %s2277_s11  ;;  %810 = vrot.lane.b32.xlu0 %v2359_v0, %s2277_s11 }
  0x30   : > { %918 = vrot.lane.b32.xlu1 %v2367_v1, %s2278_s12  ;;  %916 = vrot.lane.b32.xlu0 %v2359_v0, %s2278_s12 }
  0x34   : > { %1024 = vrot.lane.b32.xlu1 %v2367_v1, %s2279_s13  ;;  %1022 = vrot.lane.b32.xlu0 %v2359_v0, %s2279_s13 }
  0x8a   : > { %v201_v9 = vpop.permute.xlu1 %200  ;;  %v225_v10 = vpop.permute.xlu0 %224 }
  0x8e   : > { %v411_v14 = vpop.permute.xlu0 %410  ;;  %v203_v15 = vpop.permute.xlu1 %202 }
  0x8f   : > { %v207_v17 = vsel %vm206_vm0, %v201_v9, %v203_v15  ;;  %v208_v18 = vsel %vm206_vm0, %v203_v15, %v201_v9  ;;  %v2109_v15 = vld [vmem:[%s2767_s1 + $0x10] ss:$8 sm:$0x3] }
  0x90   : > { %v221_v20 = vmul.f32 %v2410_v11, %v208_v18  ;;  %v222_v21 = vmul.f32 %v2413_v12, %v207_v17 }
  0x92   : > { %2077 = vmatprep.subr.msk.mxu1 %vm252_vm1, %v222_v21  ;;  %v413_v27 = vpop.permute.xlu1 %412  ;;  %v227_v28 = vpop.permute.xlu0 %226 }
  0x93   : > { %v415_v30 = vsel %vm414_vm2, %v411_v14, %v413_v27  ;;  %v229_v31 = vsel %vm228_vm3, %v225_v10, %v227_v28  ;;  %v230_v32 = vsel %vm228_vm3, %v227_v28, %v225_v10  ;;  %2078 = vmatpush1.msk.msra.mxu1 %vm252_vm1, %v221_v20  ;;  %v416_v33 = vsel %vm414_vm2, %v413_v27, %v411_v14  ;;  %v2100_v14 = vld [vmem:[%s2768_s2 + $0x18] sm:$0xf]  ;;  %v2105_v28 = vld [vmem:[%s2768_s2 + $0x1c] sm:$0xf] }
  0x94   : > { %v244_v34 = vmul.f32 %v2433_v22, %v230_v32  ;;  %v245_v35 = vmul.f32 %v2436_v23, %v229_v31  ;;  %2079 = vmatmul.mubr.msk.f32.vlgmr.msra.gmra.mxu1 %vm248_vm5, %v223_v24  ;;  %v431_v39 = vmul.f32 %v2446_v26, %v415_v30  ;;  %v430_v42 = vmul.f32 %v2443_v25, %v416_v33 }
  0x95   : > { %613 = vmatprep.mubr.f32.mxu1 %v2273_v2  ;;  %v2572_v24 = vrot.slane %v2109_v15, %v2401_v6  ;;  %v2575_v27 = vrot.slane %v2109_v15, %v2403_v7 }
  0x96   : > { %v519_v40 = vpop.permute.xlu1 %518  ;;  %2074 = vmatprep.subr.msk.mxu0 %vm252_vm1, %v245_v35  ;;  %v517_v41 = vpop.permute.xlu0 %516 }
  0x97   : > { %v521_v43 = vsel %vm520_vm4, %v517_v41, %v519_v40  ;;  %v522_v44 = vsel %vm520_vm4, %v519_v40, %v517_v41  ;;  %2075 = vmatpush1.msk.msra.mxu0 %vm252_vm1, %v244_v34  ;;  %v2110_v34 = vld [vmem:[%s2768_s2 + $0x20] sm:$0xf] }
  0x98   : > { %v536_v46 = vmul.f32 %v2450_v29, %v522_v44  ;;  %v537_v47 = vmul.f32 %v2464_v36, %v521_v43  ;;  %2076 = vmatmul.mubr.msk.f32.vlgmr.msra.gmra.mxu0 %vm248_vm5, %v2073_v38  ;;  %2082 = vmatprep.subr.msk.mxu0 %vm252_vm1, %v431_v39 }
  0x99   : > { %2083 = vmatpush1.msk.msra.mxu0 %vm252_vm1, %v430_v42  ;;  %507 = vmatprep.mubr.f32.mxu0 %v2273_v2 }
  0x9a   : > { %v707_v52 = vpop.permute.xlu1 %706  ;;  %2087 = vmatprep.subr.msk.mxu1 %vm252_vm1, %v537_v47  ;;  %v705_v53 = vpop.permute.xlu0 %704  ;;  %2091 = vmatprep.subr.msk.mxu0 %vm252_vm1, %v2367_v1 }
  0x9b   : > { %v709_v54 = vsel %vm708_vm6, %v705_v53, %v707_v52  ;;  %v710_v55 = vsel %vm708_vm6, %v707_v52, %v705_v53  ;;  %2088 = vmatpush1.msk.msra.mxu1 %vm252_vm1, %v536_v46 }
  0x9c   : > { %v724_v57 = vmul.f32 %v2483_v45, %v709_v54  ;;  %v725_v58 = vmul.f32 %v2491_v48, %v710_v55  ;;  %2084 = vmatmul.mubr.msk.f32.vlgmr.msra.gmra.mxu0 %vm248_vm5, %v2081_v50  ;;  %2089 = vmatmul.mubr.msk.f32.vlgmr.msra.gmra.mxu1 %vm248_vm5, %v2086_v51 }
  0x9d   : > { %2092 = vmatpush1.msk.msra.mxu0 %vm252_vm1, %v2359_v0  ;;  %695 = vmatprep.mubr.f32.mxu0 %v2273_v2 }
  0x9e   : > { %v813_v63 = vpop.permute.xlu1 %812  ;;  %2096 = vmatprep.subr.msk.mxu1 %vm252_vm1, %v725_v58  ;;  %v811_v1 = vpop.permute.xlu0 %810  ;;  %801 = vmatprep.mubr.f32.mxu1 %v2273_v2 }
  0x9f   : > { %v815_v3 = vsel %vm814_vm7, %v811_v1, %v813_v63  ;;  %v816_v4 = vsel %vm814_vm7, %v813_v63, %v811_v1  ;;  %2097 = vmatpush1.msk.msra.mxu1 %vm252_vm1, %v724_v57 }
  0xa0   : > { %v830_v9 = vmul.f32 %v2513_v56, %v815_v3  ;;  %v831_v10 = vmul.f32 %v2521_v59, %v816_v4  ;;  %2093 = vmatmul.mubr.msk.f32.vlgmr.msra.gmra.mxu0 %vm248_vm5, %v2090_v61  ;;  %2098 = vmatmul.mubr.msk.f32.vlgmr.msra.gmra.mxu1 %vm248_vm5, %v2095_v62 }
  0xa1   : > { %907 = vmatprep.mubr.f32.mxu0 %v2273_v2  ;;  %1013 = vmatprep.mubr.f32.mxu1 %v2273_v2 }
  0xa2   : > { %v919_v16 = vpop.permute.xlu1 %918  ;;  %2101 = vmatprep.subr.msk.mxu0 %vm252_vm1, %v831_v10  ;;  %v917_v17 = vpop.permute.xlu0 %916 }
  0xa3   : > { %v921_v18 = vsel %vm920_vm8, %v917_v17, %v919_v16  ;;  %v922_v19 = vsel %vm920_vm8, %v919_v16, %v917_v17  ;;  %2102 = vmatpush1.msk.msra.mxu0 %vm252_vm1, %v830_v9 }
  0xa4   : > { %v936_v20 = vmul.f32 %v2543_v8, %v921_v18  ;;  %v937_v21 = vmul.f32 %v2551_v13, %v922_v19  ;;  %2103 = vmatmul.mubr.msk.f32.vlgmr.msra.gmra.mxu0 %vm248_vm5, %v2100_v14 }
  0xa5   : > { %1119 = vmatprep.mubr.f32.mxu0 %v2273_v2 }
  0xa6   : > { %v1025_v30 = vpop.permute.xlu1 %1024  ;;  %2106 = vmatprep.subr.msk.mxu1 %vm252_vm1, %v937_v21  ;;  %v1023_v31 = vpop.permute.xlu0 %1022 }
  0xa7   : > { %v1027_v32 = vsel %vm1026_vm9, %v1023_v31, %v1025_v30  ;;  %v1028_v6 = vsel %vm1026_vm9, %v1025_v30, %v1023_v31  ;;  %2107 = vmatpush1.msk.msra.mxu1 %vm252_vm1, %v936_v20 }
  0xa8   : > { %v1042_v7 = vmul.f32 %v2572_v24, %v1027_v32  ;;  %v1043_v33 = vmul.f32 %v2575_v27, %v1028_v6  ;;  %2108 = vmatmul.mubr.msk.f32.vlgmr.msra.gmra.mxu1 %vm248_vm5, %v2105_v28 }
  0xa9   : > { %1242 = vmatprep.mubr.f32.mxu1 %v2273_v2 }
  0xaa   : > { %2111 = vmatprep.subr.msk.mxu0 %vm252_vm1, %v1043_v33 }
  0xab   : > { %2112 = vmatpush1.msk.msra.mxu0 %vm252_vm1, %v1042_v7 }
  0xac   : > { %2113 = vmatmul.mubr.msk.f32.vlgmr.msra.gmra.mxu0 %vm248_vm5, %v2110_v34 }
  0xad   : > { %1322 = vmatprep.mubr.f32.mxu0 %v2273_v2 }
 0x154   : > { %v405_v35 = vpop.f32.mrf.mxu1 }
 0x156   : > { %v407_v38 = vpop.f32.mrf.mxu1 }
 0x158   : > { %v325_v37 = vpop.f32.mrf.mxu0 }
 0x159   : > { %v406_v39 = vadd.f32 %v405_v35, %v325_v37 }
 0x15a   : > { %v327_v40 = vpop.f32.mrf.mxu0 }
 0x15b   : > { %v408_v41 = vadd.f32 %v407_v38, %v327_v40 }
 0x15c   : > { %v509_v42 = vpop.f32.mrf.mxu0  ;;  %v615_v43 = vpop.f32.mrf.mxu1 }
 0x15d   : > { %v514_v44 = vadd.f32 %v509_v42, %v406_v39 }
 0x15e   : > { %v511_v46 = vpop.f32.mrf.mxu0  ;;  %v617_v47 = vpop.f32.mrf.mxu1 }
 0x15f   : > { %v515_v49 = vadd.f32 %v511_v46, %v408_v41  ;;  %v620_v50 = vadd.f32 %v615_v43, %v514_v44 }
 0x160   : > { %v697_v51 = vpop.f32.mrf.mxu0  ;;  %v803_v52 = vpop.f32.mrf.mxu1 }
 0x161   : > { %v621_v53 = vadd.f32 %v617_v47, %v515_v49  ;;  %v702_v54 = vadd.f32 %v697_v51, %v620_v50 }
 0x162   : > { %v699_v55 = vpop.f32.mrf.mxu0  ;;  %v805_v60 = vpop.f32.mrf.mxu1 }
 0x163   : > { %v703_v57 = vadd.f32 %v699_v55, %v621_v53  ;;  %v808_v58 = vadd.f32 %v803_v52, %v702_v54  ;;  %v2114_v53 = vld [vmem:[%s2769_s3 + $0x4] sm:$0xf] }
 0x164   : > { %v909_v61 = vpop.f32.mrf.mxu0 }
 0x165   : > { %v809_v62 = vadd.f32 %v805_v60, %v703_v57  ;;  %v914_v63 = vadd.f32 %v909_v61, %v808_v58  ;;  %v1158_v60 = vld [vmem:[%s2769_s3] sm:$0xf] }
 0x166   : > { %v911_v1 = vpop.f32.mrf.mxu0 }
 0x167   : > { %v915_v9 = vadd.f32 %v911_v1, %v809_v62 }
 0x168   : > { %v1015_v3 = vpop.f32.mrf.mxu1 }
 0x169   : > { %v1020_v10 = vadd.f32 %v1015_v3, %v914_v63  ;;  %v2121_v3 = vld [vmem:[%s2769_s3 + $0x8] sm:$0xf] }
 0x16a   : > { %v1017_v4 = vpop.f32.mrf.mxu1 }
 0x16b   : > { %v1021_v15 = vadd.f32 %v1017_v4, %v915_v9 }
 0x16c   : > { %v1121_v14 = vpop.f32.mrf.mxu0 }
 0x16d   : > { %v1126_v16 = vadd.f32 %v1121_v14, %v1020_v10 }
 0x16e   : > { %v1123_v17 = vpop.f32.mrf.mxu0 }
 0x16f   : > { %v1127_v18 = vadd.f32 %v1123_v17, %v1021_v15  ;;  %v1128_v19 = vsel %vm252_vm1, %v1126_v16, 0.0  ;;  %v2125_v15 = vld [vmem:[%s2769_s3 + $0xc] sm:$0xf] }
 0x171   : > { %v1129_v20 = vsel %vm252_vm1, %v1127_v18, 0.0 }
 0x172   : > { %v1130_v21 = vadd.f32 %v1129_v20, %v1128_v19 }
 0x174   : > { %1131 = vadd.xlane.f32.xlu0 %v1130_v21  ;;  %v2133_v21 = vld [vmem:[%s2769_s3 + $0x14] sm:$0xf] }
 0x1fd   : > { %v1132_v28 = vpop.xlane.xlu0 %1131 }
 0x1fe   : > { %v1133_v30 = vmul.f32 0.00390625, %v1132_v28 }
 0x200   : > { %v1134_v31 = vsub.f32 %v1126_v16, %v1133_v30  ;;  %v1135_v32 = vsub.f32 %v1127_v18, %v1133_v30  ;;  %v2129_v16 = vld [vmem:[%s2769_s3 + $0x10] sm:$0xf] }
 0x202   : > { %v1136_v6 = vmul.f32 %v1134_v31, %v1134_v31  ;;  %v1137_v7 = vmul.f32 %v1135_v32, %v1135_v32 }
 0x204   : > { %v1138_v33 = vsel %vm252_vm1, %v1136_v6, 0.0  ;;  %v1139_v34 = vsel %vm252_vm1, %v1137_v7, 0.0  ;;  %v2137_v6 = vld [vmem:[%s2769_s3 + $0x18] sm:$0xf] }
 0x205   : > { %v1140_v35 = vadd.f32 %v1139_v34, %v1138_v33 }
 0x207   : > { %1141 = vadd.xlane.f32.xlu1 %v1140_v35 }
 0x290   : > { %v1142_v37 = vpop.xlane.xlu1 %1141 }
 0x291   : > { %v1143_v38 = vmul.f32 0.00390625, %v1142_v37  ;;  %v2141_v37 = vld [vmem:[%s2769_s3 + $0x1c] sm:$0xf] }
 0x293   : > { %v1144_v39 = vadd.f32 1e-05, %v1143_v38 }
 0x295   : > { %2205 = vrsqrt.f32 %v1144_v39 }
 0x2a2   : > { %v2206_v40 = vpop.eup %2205 }
 0x2a3   : > { %v1146_v41 = vmul.f32 %v2206_v40, %v1134_v31  ;;  %v1147_v42 = vmul.f32 %v2206_v40, %v1135_v32 }
 0x2a5   : > { %v1148_v43 = vmax.f32 %v1146_v41, 0.0  ;;  %v1149_v44 = vmax.f32 %v1147_v42, 0.0 }
 0x2a7   : > { %1161 = vrot.lane.b32.xlu1 %v1149_v44, %s2272_s7  ;;  %1159 = vrot.lane.b32.xlu0 %v1148_v43, %s2272_s7  ;;  %s188_s7 = sand.u32 1, %s2261_s16  }
 0x2a8   : > { %s1992_s5 = scalar_lea.sflag [#allocation3], %s188_s7 }
 0x2ab   : > { %1152 = vrot.lane.b32.xlu1 %v1149_v44, %s2271_s6  ;;  %1150 = vrot.lane.b32.xlu0 %v1148_v43, %s2271_s6 }
 0x2af   : > { %1331 = vrot.lane.b32.xlu1 %v1149_v44, %s2274_s8  ;;  %1329 = vrot.lane.b32.xlu0 %v1148_v43, %s2274_s8  ;;  %s2069_s8 = sshll.u32 %s188_s7, 3 }
 0x2b3   : > { %1423 = vrot.lane.b32.xlu1 %v1149_v44, %s2275_s9  ;;  %1421 = vrot.lane.b32.xlu0 %v1148_v43, %s2275_s9  ;;  %s2155_s9 = sshll.u32 %s2327_s19, 7  ;;  %s2215_s19 = scalar_lea.vmem %s2214_s22, 256 }
 0x2b4   : > { %s2004_s30 = scalar_lea.hbm %s2770_s4, %s2155_s9 }
 0x2b7   : > { %1599 = vrot.lane.b32.xlu1 %v1149_v44, %s2276_s10  ;;  %1597 = vrot.lane.b32.xlu0 %v1148_v43, %s2276_s10  ;;  %s190_s10 = scalar_lea.vmem [#allocation2], %s2069_s8 }
 0x2bb   : > { %1691 = vrot.lane.b32.xlu1 %v1149_v44, %s2277_s11  ;;  %1689 = vrot.lane.b32.xlu0 %v1148_v43, %s2277_s11  ;;  %s2006_s11 = sshll.u32 %s190_s10, 4  ;;  %s2007_s11 = int_to_ptr.vmem [resolvable:$true] %s2006_s11 }
 0x2bc   : > { %s2209_s14 = scalar_lea.vmem %s2007_s11, 128  ;;  %p2216_p0 = scmp.lt.s32.totalorder %s2007_s11, %s2214_s22 }
 0x2bd   : > { %p2210_p11 = scmp.ne.s32.totalorder %s2007_s11, %s2209_s14  ;;  %p2217_p1 = scmp.lt.s32.totalorder %s2215_s19, %s2209_s14 }
 0x2bf   : > { %1783 = vrot.lane.b32.xlu1 %v1149_v44, %s2278_s12  ;;  %1781 = vrot.lane.b32.xlu0 %v1148_v43, %s2278_s12  ;;  %p2211_p12 = pnand %p2210_p11, %p2344_p5  ;;  %p2218_p2 = por %p2217_p1, %p2216_p0 }
 0x2c1   : > { %p2212_p13 = pneg %p2211_p12 }
 0x2c3   : > { %1875 = vrot.lane.b32.xlu1 %v1149_v44, %s2279_s13  ;;  %1873 = vrot.lane.b32.xlu0 %v1148_v43, %s2279_s13  ;;  %p2219_p3 = pnand %p2218_p2, %p2212_p13 }
 0x319   : > { %v1162_v46 = vpop.permute.xlu1 %1161  ;;  %v1160_v47 = vpop.permute.xlu0 %1159 }
 0x31a   : > { %v1163_v49 = vsel %vm228_vm3, %v1160_v47, %v1162_v46  ;;  %v1164_v50 = vsel %vm228_vm3, %v1162_v46, %v1160_v47 }
 0x31b   : > { %v1165_v51 = vmul.f32 %v1164_v50, %v2433_v22  ;;  %v1166_v52 = vmul.f32 %v1163_v49, %v2436_v23 }
 0x31d   : > { %v1153_v54 = vpop.permute.xlu1 %1152  ;;  %2115 = vmatprep.subr.msk.mxu1 %vm252_vm1, %v1166_v52  ;;  %v1151_v55 = vpop.permute.xlu0 %1150 }
 0x31e   : > { %v1154_v57 = vsel %vm206_vm0, %v1151_v55, %v1153_v54  ;;  %v1155_v58 = vsel %vm206_vm0, %v1153_v54, %v1151_v55  ;;  %2116 = vmatpush1.msk.msra.mxu1 %vm252_vm1, %v1165_v51 }
 0x31f   : > { %v1156_v22 = vmul.f32 %v1155_v58, %v2410_v11  ;;  %v1157_v23 = vmul.f32 %v1154_v57, %v2413_v12  ;;  %2117 = vmatmul.mubr.msk.f32.vlgmr.msra.gmra.mxu1 %vm248_vm5, %v2114_v53 }
 0x320   : > { %1412 = vmatprep.mubr.f32.mxu1 %v2273_v2 }
 0x321   : > { %v1332_v61 = vpop.permute.xlu1 %1331  ;;  %2118 = vmatprep.subr.msk.mxu0 %vm252_vm1, %v1157_v23  ;;  %v1330_v62 = vpop.permute.xlu0 %1329 }
 0x322   : > { %v1333_v63 = vsel %vm414_vm2, %v1330_v62, %v1332_v61  ;;  %v1334_v11 = vsel %vm414_vm2, %v1332_v61, %v1330_v62  ;;  %2119 = vmatpush1.msk.msra.mxu0 %vm252_vm1, %v1156_v22 }
 0x323   : > { %v1335_v12 = vmul.f32 %v1334_v11, %v2443_v25  ;;  %v1336_v1 = vmul.f32 %v1333_v63, %v2446_v26  ;;  %2120 = vmatmul.mubr.msk.f32.vlgmr.msra.gmra.mxu0 %vm248_vm5, %v1158_v60 }
 0x324   : > { %1504 = vmatprep.mubr.f32.mxu0 %v2273_v2 }
 0x325   : > { %v1424_v4 = vpop.permute.xlu1 %1423  ;;  %2122 = vmatprep.subr.msk.mxu1 %vm252_vm1, %v1336_v1  ;;  %v1422_v9 = vpop.permute.xlu0 %1421 }
 0x326   : > { %v1425_v10 = vsel %vm520_vm4, %v1422_v9, %v1424_v4  ;;  %v1426_v25 = vsel %vm520_vm4, %v1424_v4, %v1422_v9  ;;  %2123 = vmatpush1.msk.msra.mxu1 %vm252_vm1, %v1335_v12 }
 0x327   : > { %v1427_v26 = vmul.f32 %v1426_v25, %v2450_v29  ;;  %v1428_v14 = vmul.f32 %v1425_v10, %v2464_v36  ;;  %2130 = vmatprep.subr.msk.mxu1 %vm252_vm1, %v1149_v44  ;;  %2124 = vmatmul.mubr.msk.f32.vlgmr.msra.gmra.mxu1 %vm248_vm5, %v2121_v3 }
 0x328   : > { %2131 = vmatpush1.msk.msra.mxu1 %vm252_vm1, %v1148_v43  ;;  %1588 = vmatprep.mubr.f32.mxu1 %v2273_v2 }
 0x329   : > { %v1600_v17 = vpop.permute.xlu1 %1599  ;;  %2126 = vmatprep.subr.msk.mxu0 %vm252_vm1, %v1428_v14  ;;  %v1598_v29 = vpop.permute.xlu0 %1597 }
 0x32a   : > { %v1601_v36 = vsel %vm708_vm6, %v1598_v29, %v1600_v17  ;;  %v1602_v18 = vsel %vm708_vm6, %v1600_v17, %v1598_v29  ;;  %2127 = vmatpush1.msk.msra.mxu0 %vm252_vm1, %v1427_v26 }
 0x32b   : > { %v1603_v19 = vmul.f32 %v1601_v36, %v2483_v45  ;;  %v1604_v20 = vmul.f32 %v1602_v18, %v2491_v48  ;;  %2128 = vmatmul.mubr.msk.f32.vlgmr.msra.gmra.mxu0 %vm248_vm5, %v2125_v15  ;;  %2132 = vmatmul.mubr.msk.f32.vlgmr.msra.gmra.mxu1 %vm248_vm5, %v2129_v16 }
 0x32c   : > { %1680 = vmatprep.mubr.f32.mxu0 %v2273_v2  ;;  %1772 = vmatprep.mubr.f32.mxu1 %v2273_v2 }
 0x32d   : > { %v1692_v28 = vpop.permute.xlu1 %1691  ;;  %2134 = vmatprep.subr.msk.mxu0 %vm252_vm1, %v1604_v20  ;;  %v1690_v30 = vpop.permute.xlu0 %1689 }
 0x32e   : > { %v1693_v45 = vsel %vm814_vm7, %v1690_v30, %v1692_v28  ;;  %v1694_v48 = vsel %vm814_vm7, %v1692_v28, %v1690_v30  ;;  %2135 = vmatpush1.msk.msra.mxu0 %vm252_vm1, %v1603_v19 }
 0x32f   : > { %v1695_v31 = vmul.f32 %v1693_v45, %v2513_v56  ;;  %v1696_v32 = vmul.f32 %v1694_v48, %v2521_v59  ;;  %2136 = vmatmul.mubr.msk.f32.vlgmr.msra.gmra.mxu0 %vm248_vm5, %v2133_v21 }
 0x330   : > { %1864 = vmatprep.mubr.f32.mxu0 %v2273_v2 }
 0x331   : > { %v1784_v7 = vpop.permute.xlu1 %1783  ;;  %2138 = vmatprep.subr.msk.mxu1 %vm252_vm1, %v1696_v32  ;;  %v1782_v33 = vpop.permute.xlu0 %1781 }
 0x332   : > { %v1785_v34 = vsel %vm920_vm8, %v1782_v33, %v1784_v7  ;;  %v1786_v56 = vsel %vm920_vm8, %v1784_v7, %v1782_v33  ;;  %2139 = vmatpush1.msk.msra.mxu1 %vm252_vm1, %v1695_v31 }
 0x333   : > { %v1787_v59 = vmul.f32 %v1785_v34, %v2543_v8  ;;  %v1788_v35 = vmul.f32 %v1786_v56, %v2551_v13  ;;  %2140 = vmatmul.mubr.msk.f32.vlgmr.msra.gmra.mxu1 %vm248_vm5, %v2137_v6 }
 0x334   : > { %1956 = vmatprep.mubr.f32.mxu1 %v2273_v2  ;;  %v2145_v2 = vld [vmem:[%s2769_s3 + $0x20] sm:$0xf] }
 0x335   : > { %v1876_v38 = vpop.permute.xlu1 %1875  ;;  %2142 = vmatprep.subr.msk.mxu0 %vm252_vm1, %v1788_v35  ;;  %v1874_v39 = vpop.permute.xlu0 %1873 }
 0x336   : > { %v1877_v40 = vsel %vm1026_vm9, %v1874_v39, %v1876_v38  ;;  %v1878_v8 = vsel %vm1026_vm9, %v1876_v38, %v1874_v39  ;;  %2143 = vmatpush1.msk.msra.mxu0 %vm252_vm1, %v1787_v59 }
 0x337   : > { %v1879_v13 = vmul.f32 %v1877_v40, %v2572_v24  ;;  %v1880_v41 = vmul.f32 %v1878_v8, %v2575_v27  ;;  %2144 = vmatmul.mubr.msk.f32.vlgmr.msra.gmra.mxu0 %vm248_vm5, %v2141_v37 }
 0x339   : > { %2146 = vmatprep.subr.msk.mxu1 %vm252_vm1, %v1880_v41 }
 0x33a   : > { %2147 = vmatpush1.msk.msra.mxu1 %vm252_vm1, %v1879_v13 }
 0x33b   : > { %2148 = vmatmul.mubr.msk.f32.vlgmr.msra.gmra.mxu1 %vm248_vm5, %v2145_v2 }
 0x3df   : > { %v1244_v5 = vpop.f32.mrf.mxu1 }
 0x3e1   : > { %v1246_v42 = vpop.f32.mrf.mxu1 }
 0x3e3   : > { %v1324_v43 = vpop.f32.mrf.mxu0 }
 0x3e4   : > { %v1325_v44 = vadd.f32 %v1324_v43, %v1244_v5 }
 0x3e5   : > { %v1326_v46 = vpop.f32.mrf.mxu0 }
 0x3e6   : > { %v1327_v24 = vadd.f32 %v1326_v46, %v1246_v42 }
 0x3e7   : > { %v1414_v47 = vpop.f32.mrf.mxu1 }
 0x3e8   : > { %v1419_v27 = vadd.f32 %v1414_v47, %v1325_v44 }
 0x3e9   : > { %v1416_v49 = vpop.f32.mrf.mxu1 }
 0x3ea   : > { %v1420_v50 = vadd.f32 %v1416_v49, %v1327_v24 }
 0x3eb   : > { %v1506_v51 = vpop.f32.mrf.mxu0  ;;  %v1590_v52 = vpop.f32.mrf.mxu1 }
 0x3ec   : > { %v1511_v53 = vadd.f32 %v1506_v51, %v1419_v27 }
 0x3ed   : > { %v1508_v54 = vpop.f32.mrf.mxu0  ;;  %v1592_v58 = vpop.f32.mrf.mxu1 }
 0x3ee   : > { %v1512_v55 = vadd.f32 %v1508_v54, %v1420_v50  ;;  %v1595_v57 = vadd.f32 %v1590_v52, %v1511_v53 }
 0x3ef   : > { %v1682_v22 = vpop.f32.mrf.mxu0 }
 0x3f0   : > { %v1596_v23 = vadd.f32 %v1592_v58, %v1512_v55  ;;  %v1687_v60 = vadd.f32 %v1682_v22, %v1595_v57 }
 0x3f1   : > { %v1684_v61 = vpop.f32.mrf.mxu0 }
 0x3f2   : > { %v1688_v63 = vadd.f32 %v1684_v61, %v1596_v23 }
 0x3f3   : > { %v1774_v62 = vpop.f32.mrf.mxu1 }
 0x3f4   : > { %v1779_v11 = vadd.f32 %v1774_v62, %v1687_v60 }
 0x3f5   : > { %v1776_v12 = vpop.f32.mrf.mxu1 }
 0x3f6   : > { %v1780_v4 = vadd.f32 %v1776_v12, %v1688_v63 }
 0x3f7   : > { %v1866_v1 = vpop.f32.mrf.mxu0 }
 0x3f8   : > { %v1871_v9 = vadd.f32 %v1866_v1, %v1779_v11 }
 0x3f9   : > { %v1868_v3 = vpop.f32.mrf.mxu0 }
 0x3fa   : > { %v1872_v25 = vadd.f32 %v1868_v3, %v1780_v4 }
 0x3fb   : > { %v1958_v10 = vpop.f32.mrf.mxu1 }
 0x3fc   : > { %v1963_v26 = vadd.f32 %v1958_v10, %v1871_v9 }
 0x3fd   : > { %v1960_v14 = vpop.f32.mrf.mxu1 }
 0x3fe   : > { %v1964_v15 = vadd.f32 %v1960_v14, %v1872_v25  ;;  %v1965_v16 = vsel %vm252_vm1, %v1963_v26, 0.0 }
 0x400   : > { %v1966_v17 = vsel %vm252_vm1, %v1964_v15, 0.0 }
 0x401   : > { %v1967_v29 = vadd.f32 %v1966_v17, %v1965_v16 }
 0x403   : > { %1968 = vadd.xlane.f32.xlu0 %v1967_v29 }
 0x48c   : > { %v1969_v36 = vpop.xlane.xlu0 %1968 }
 0x48d   : > { %v1970_v18 = vmul.f32 0.00390625, %v1969_v36 }
 0x48f   : > { %v1971_v19 = vsub.f32 %v1963_v26, %v1970_v18  ;;  %v1972_v20 = vsub.f32 %v1964_v15, %v1970_v18 }
 0x491   : > { %v1973_v21 = vmul.f32 %v1971_v19, %v1971_v19  ;;  %v1974_v28 = vmul.f32 %v1972_v20, %v1972_v20 }
 0x493   : > { %v1975_v30 = vsel %vm252_vm1, %v1973_v21, 0.0  ;;  %v1976_v45 = vsel %vm252_vm1, %v1974_v28, 0.0 }
 0x494   : > { %v1977_v48 = vadd.f32 %v1976_v45, %v1975_v30 }
 0x496   : > { %1978 = vadd.xlane.f32.xlu1 %v1977_v48 }
 0x51f   : > { %v1979_v31 = vpop.xlane.xlu1 %1978 }
 0x520   : > { %v1980_v32 = vmul.f32 0.00390625, %v1979_v31 }
 0x522   : > { %v1981_v6 = vadd.f32 1e-05, %v1980_v32 }
 0x524   : > { %2207 = vrsqrt.f32 %v1981_v6 }
 0x531   : > { %v2208_v7 = vpop.eup %2207 }
 0x532   : > { %v1983_v33 = vmul.f32 %v2208_v7, %v1971_v19  ;;  %v1984_v34 = vmul.f32 %v2208_v7, %v1972_v20 }
 0x534   : > { %v1987_v56 = vcombine.low %v1983_v33, %v1984_v34 }
 0x536   : > { %v1989_v59 = vadd.f32 %v1987_v56, %v2359_v0 }
 0x538   : > { %1990 = vst [vmem:[%s190_s10] sm:$0xff] %v1989_v59 }
 0x539   : > { %2222 = shalt.err (!%p2219_p3)
}
 0x53a   : > { %s2223_s23 = scalar_lea.hbm %s2004_s30, 128  ;;  %s2227_s29 = scalar_lea.hbm %s2770_s4, 256 }
 0x53b   : > { %p2224_p4 = scmp.ne.s32.totalorder %s2004_s30, %s2223_s23  ;;  %p2228_p9 = scmp.lt.s32.totalorder %s2004_s30, %s2770_s4 }
 0x53c   : > { %p2229_p10 = scmp.lt.s32.totalorder %s2227_s29, %s2223_s23 }
 0x53d   : > { %p2225_p7 = pnand %p2224_p4, %p2344_p5 }
 0x53e   : > { %p2230_p11 = por %p2229_p10, %p2228_p9 }
 0x53f   : > { %p2226_p8 = pneg %p2225_p7 }
 0x541   : > { %p2231_p12 = pnand %p2230_p11, %p2226_p8 }
 0x543   : > { %2234 = shalt.err (!%p2231_p12)
}
 0x544   : > { %2156 = dma.vmem_to_hbm [thread:$0]  (%p2344_p5), %s2007_s11, 128, %s2004_s30, %s1992_s5  }
 0x545 PF: > { %p2162_p13 = scmp.ge.s32.totalorder %s2269_s18, 2  ;;  %s2018_s8 = sand.u32 1, %s2257_s15  }
 0x546   : > { %s2019_s9 = scalar_lea.sflag [#allocation3], %s2018_s8 }
 0x547   : > { %p2159_p0 = pnand %p2162_p13, %p2348_p6 }
 0x549   : > { %p2160_p1 = pneg %p2159_p0 }
 0x54b   : > { %2252 = dma.done.wait (%p2160_p1), %s2019_s9, 128  }
 0x54c   : > { %2254 = vsyncadd (%p2160_p1), %s2019_s9, 4294967168  ;;  %p14_p2 = scmp.ge.s32.totalorder %s2331_s21, 4   ;;  %s2773_s15 = smov %s2261_s16 }
 0x54d   : > { %s2774_s16 = smov %s2265_s17  ;;  %s2775_s17 = smov %s2342_s24 }
 0x54e   : > { %s2776_s18 = smov %s2331_s21  ;;  %16 = sbr.rel (!%p14_p2) target bundleno = 3 (0x3), region = 94 }
 0x553   :  { %2024 = vsyncpa [#allocation3], 1 }
 0x554   :  { %2026 = vsyncpa [#allocation3 + $0x1], 1 }

// kernel: tpu_custom_call.1
= control target key start
LH: loop header
LB: loop body
LE: loop exit
PB: predicated region body
PF: predicated region fallthrough
CT: control target
= control target key end

     0   :  { %9 = vsyncpa [#allocation3], 0  ;;  %s2766_s0 = inlined_call_operand.vmem [shape: f32[2,4,256], index: 0, kind: input, shape index: {}]   ;;  %s2767_s1 = inlined_call_operand.vmem [shape: f32[9,256], index: 1, kind: input, shape index: {}]   ;;  %s2768_s2 = inlined_call_operand.vmem [shape: f32[9,4,4], index: 2, kind: input, shape index: {}]   ;;  %s2769_s3 = inlined_call_operand.vmem [shape: f32[9,4,4], index: 3, kind: input, shape index: {}]   ;;  %s2770_s4 = inlined_call_operand.hbm [shape: f32[2,4,256], index: 4, kind: output, shape index: {}]  }
   0x1   :  { %11 = vsyncpa [#allocation3 + $0x1], 0  ;;  %s2306_s15 = smov 0   ;;  %s2308_s16 = smov 0  }
   0x2   :  { %s2310_s17 = smov 0   ;;  %s2312_s18 = smov 0  }
   0x3 LB: > { %s2327_s19 = sadd.s32 4294967295, %s2269_s18   ;;  %s2065_s20 = sadd.s32 4294967294, %s2269_s18   ;;  %s2269_s18 = sphi %s2312_s18, %s2776_s18   ;;  %s2265_s17 = sphi %s2310_s17, %s2775_s17   ;;  %s2261_s16 = sphi %s2308_s16, %s2774_s16   ;;  %s2257_s15 = sphi %s2306_s15, %s2773_s15  }
   0x4   : > { %s2331_s21 = sadd.s32 1, %s2269_s18   ;;  %s113_s22 = sadd.s32 1, %s2265_s17 }
   0x5   : > { %s110_s23 = ssub.s32 %s2269_s18, %s2331_s21  ;;  %p123_p0 = scmp.ne.s32.totalorder %s2265_s17, %s2261_s16 }
   0x6   : > { %p111_p1 = scmp.eq.s32.totalorder %s110_s23, 0  ;;  %p124_p2 = scmp.eq.s32.totalorder %s2327_s19, 1 }
   0x7   : > { %p129_p3 = scmp.ne.s32.totalorder %s2261_s16, %s2257_s15  ;;  %p130_p4 = scmp.eq.s32.totalorder %s2065_s20, 1 }
   0x8   : > { %s2342_s24 = scalar_select %p111_p1, %s2265_s17, %s113_s22  }
   0x9   : > { %p2344_p5 = por %p124_p2, %p123_p0  ;;  %p2348_p6 = por %p130_p4, %p129_p3 }
   0xa   : > { %p2068_p7 = scmp.ge.s32.totalorder %s2269_s18, 1  ;;  %p165_p8 = scmp.lt.s32.totalorder %s2269_s18, 3 }
   0xc   : > { %p166_p9 = pnand %p2068_p7, %p165_p8 }
   0xd   : > { %p191_p10 = scmp.lt.s32.totalorder (!%p166_p9), %s2327_s19, 1  ;;  %s2271_s6 = smov (!%p166_p9), 17  }
   0xe   : > { %169 = sbr.rel (%p166_p9) target bundleno = 1349 (0x545), region = 36  ;;  %s2272_s7 = smov (!%p166_p9), 16  }
   0xf   : > { %s2274_s8 = smov (!%p166_p9), 15   ;;  %s2275_s9 = smov (!%p166_p9), 1  }
  0x10   : > { %s2276_s10 = smov (!%p166_p9), 127   ;;  %s2277_s11 = smov (!%p166_p9), 113  }
  0x11   : > { %s2278_s12 = smov (!%p166_p9), 112   ;;  %s2279_s13 = smov (!%p166_p9), 111  }
  0x12   : > { %s2280_s20 = smov (!%p166_p9), [#allocation2]  }
  0x13   : > { %s192_s27 = scalar_select %p191_p10, %s2327_s19, 1  ;;  %v2273_v2 = vmov 0.0   ;;  %v204_v3 = vlaneseq  ;;  %v209_v8 = vld [vmem:[%s2767_s1] ss:$8 sm:$0x3]  ;;  %vm252_vm1 = vcmask 1043456  }
  0x14   : > { %323 = vmatprep.mubr.f32.mxu0 %v2273_v2  ;;  %403 = vmatprep.mubr.f32.mxu1 %v2273_v2  ;;  %v2072_v13 = vld [vmem:[%s2767_s1 + $0x1] ss:$8 sm:$0x3]  ;;  %v2080_v16 = vld [vmem:[%s2767_s1 + $0x2] ss:$8 sm:$0x3] }
  0x15   : > { %s2154_s28 = sshll.u32 %s192_s27, 3  ;;  %v212_v4 = vshrl.u32 %v204_v3, 7  ;;  %v2399_v5 = vand.u32 127, %v204_v3  ;;  %v2085_v19 = vld [vmem:[%s2767_s1 + $0x3] ss:$8 sm:$0x3] }
  0x16   : > { %s195_s5 = scalar_lea.vmem %s2766_s0, %s2154_s28  ;;  %v223_v24 = vld [vmem:[%s2768_s2] sm:$0xf]  ;;  %vm248_vm5 = vcmask 31744   ;;  %v2094_v37 = vld [vmem:[%s2767_s1 + $0x5] ss:$8 sm:$0x3] }
  0x17   : > { %v2359_v0 = vld [vmem:[%s195_s5] sm:$0xff]  ;;  %v2401_v6 = vsub.s32 0, %v212_v4  ;;  %v2403_v7 = vsub.s32 1, %v212_v4  ;;  %vm206_vm0 = vcmp.lt.s32.totalorder %v2399_v5, 17  ;;  %vm414_vm2 = vcmp.lt.s32.totalorder %v2399_v5, 15  ;;  %s2213_s22 = sshll.u32 %s2280_s20, 4  ;;  %s2214_s22 = int_to_ptr.vmem [resolvable:$false] %s2213_s22 }
  0x18   : > { %200 = vrot.lane.b32.xlu1 %v2359_v0, %s2271_s6  ;;  %224 = vrot.lane.b32.xlu0 %v2359_v0, %s2272_s7  ;;  %v2367_v1 = vcombine.high %v2359_v0, %v2359_v0  ;;  %vm228_vm3 = vcmp.lt.s32.totalorder %v2399_v5, 16  ;;  %vm520_vm4 = vcmp.lt.s32.totalorder %v2399_v5, 1  ;;  %v2073_v38 = vld [vmem:[%s2768_s2 + $0x4] sm:$0xf]  ;;  %vm708_vm6 = vcmp.lt.s32.totalorder %v2399_v5, 127 }
  0x19   : > { %v2410_v11 = vrot.slane %v209_v8, %v2401_v6  ;;  %v2413_v12 = vrot.slane %v209_v8, %v2403_v7  ;;  %v2433_v22 = vrot.slane %v2072_v13, %v2401_v6  ;;  %v2436_v23 = vrot.slane %v2072_v13, %v2403_v7  ;;  %v2099_v49 = vld [vmem:[%s2767_s1 + $0x6] ss:$8 sm:$0x3]  ;;  %v2081_v50 = vld [vmem:[%s2768_s2 + $0x8] sm:$0xf] }
  0x1a   : > { %v2443_v25 = vrot.slane %v2080_v16, %v2401_v6  ;;  %v2446_v26 = vrot.slane %v2080_v16, %v2403_v7  ;;  %v2450_v29 = vrot.slane %v2085_v19, %v2401_v6  ;;  %v2464_v36 = vrot.slane %v2085_v19, %v2403_v7  ;;  %v2086_v51 = vld [vmem:[%s2768_s2 + $0xc] sm:$0xf]  ;;  %v2090_v61 = vld [vmem:[%s2768_s2 + $0x10] sm:$0xf]  ;;  %v2095_v62 = vld [vmem:[%s2768_s2 + $0x14] sm:$0xf] }
  0x1b   : > { %v2483_v45 = vrot.slane %v2094_v37, %v2401_v6  ;;  %v2491_v48 = vrot.slane %v2094_v37, %v2403_v7  ;;  %v2513_v56 = vrot.slane %v2099_v49, %v2401_v6  ;;  %vm814_vm7 = vcmp.lt.s32.totalorder %v2399_v5, 113  ;;  %v2104_v60 = vld [vmem:[%s2767_s1 + $0x7] ss:$8 sm:$0x3] }
  0x1c   : > { %410 = vrot.lane.b32.xlu0 %v2359_v0, %s2274_s8  ;;  %202 = vrot.lane.b32.xlu1 %v2367_v1, %s2271_s6  ;;  %v2521_v59 = vrot.slane %v2099_v49, %v2403_v7  ;;  %v2543_v8 = vrot.slane %v2104_v60, %v2401_v6  ;;  %vm920_vm8 = vcmp.lt.s32.totalorder %v2399_v5, 112  ;;  %v2551_v13 = vrot.slane %v2104_v60, %v2403_v7 }
  0x1d   : > { %vm1026_vm9 = vcmp.lt.s32.totalorder %v2399_v5, 111 }
  0x20   : > { %412 = vrot.lane.b32.xlu1 %v2367_v1, %s2274_s8  ;;  %226 = vrot.lane.b32.xlu0 %v2367_v1, %s2272_s7 }
  0x24   : > { %518 = vrot.lane.b32.xlu1 %v2367_v1, %s2275_s9  ;;  %516 = vrot.lane.b32.xlu0 %v2359_v0, %s2275_s9 }
  0x28   : > { %706 = vrot.lane.b32.xlu1 %v2367_v1, %s2276_s10  ;;  %704 = vrot.lane.b32.xlu0 %v2359_v0, %s2276_s10 }
  0x2c   : > { %812 = vrot.lane.b32.xlu1 %v2367_v1, %s2277_s11  ;;  %810 = vrot.lane.b32.xlu0 %v2359_v0, %s2277_s11 }
  0x30   : > { %918 = vrot.lane.b32.xlu1 %v2367_v1, %s2278_s12  ;;  %916 = vrot.lane.b32.xlu0 %v2359_v0, %s2278_s12 }
  0x34   : > { %1024 = vrot.lane.b32.xlu1 %v2367_v1, %s2279_s13  ;;  %1022 = vrot.lane.b32.xlu0 %v2359_v0, %s2279_s13 }
  0x8a   : > { %v201_v9 = vpop.permute.xlu1 %200  ;;  %v225_v10 = vpop.permute.xlu0 %224 }
  0x8e   : > { %v411_v14 = vpop.permute.xlu0 %410  ;;  %v203_v15 = vpop.permute.xlu1 %202 }
  0x8f   : > { %v207_v17 = vsel %vm206_vm0, %v201_v9, %v203_v15  ;;  %v208_v18 = vsel %vm206_vm0, %v203_v15, %v201_v9  ;;  %v2109_v15 = vld [vmem:[%s2767_s1 + $0x10] ss:$8 sm:$0x3] }
  0x90   : > { %v221_v20 = vmul.f32 %v2410_v11, %v208_v18  ;;  %v222_v21 = vmul.f32 %v2413_v12, %v207_v17 }
  0x92   : > { %2077 = vmatprep.subr.msk.mxu1 %vm252_vm1, %v222_v21  ;;  %v413_v27 = vpop.permute.xlu1 %412  ;;  %v227_v28 = vpop.permute.xlu0 %226 }
  0x93   : > { %v415_v30 = vsel %vm414_vm2, %v411_v14, %v413_v27  ;;  %v229_v31 = vsel %vm228_vm3, %v225_v10, %v227_v28  ;;  %v230_v32 = vsel %vm228_vm3, %v227_v28, %v225_v10  ;;  %2078 = vmatpush1.msk.msra.mxu1 %vm252_vm1, %v221_v20  ;;  %v416_v33 = vsel %vm414_vm2, %v413_v27, %v411_v14  ;;  %v2100_v14 = vld [vmem:[%s2768_s2 + $0x18] sm:$0xf]  ;;  %v2105_v28 = vld [vmem:[%s2768_s2 + $0x1c] sm:$0xf] }
  0x94   : > { %v244_v34 = vmul.f32 %v2433_v22, %v230_v32  ;;  %v245_v35 = vmul.f32 %v2436_v23, %v229_v31  ;;  %2079 = vmatmul.mubr.msk.f32.vlgmr.msra.gmra.mxu1 %vm248_vm5, %v223_v24  ;;  %v431_v39 = vmul.f32 %v2446_v26, %v415_v30  ;;  %v430_v42 = vmul.f32 %v2443_v25, %v416_v33 }
  0x95   : > { %613 = vmatprep.mubr.f32.mxu1 %v2273_v2  ;;  %v2572_v24 = vrot.slane %v2109_v15, %v2401_v6  ;;  %v2575_v27 = vrot.slane %v2109_v15, %v2403_v7 }
  0x96   : > { %v519_v40 = vpop.permute.xlu1 %518  ;;  %2074 = vmatprep.subr.msk.mxu0 %vm252_vm1, %v245_v35  ;;  %v517_v41 = vpop.permute.xlu0 %516 }
  0x97   : > { %v521_v43 = vsel %vm520_vm4, %v517_v41, %v519_v40  ;;  %v522_v44 = vsel %vm520_vm4, %v519_v40, %v517_v41  ;;  %2075 = vmatpush1.msk.msra.mxu0 %vm252_vm1, %v244_v34  ;;  %v2110_v34 = vld [vmem:[%s2768_s2 + $0x20] sm:$0xf] }
  0x98   : > { %v536_v46 = vmul.f32 %v2450_v29, %v522_v44  ;;  %v537_v47 = vmul.f32 %v2464_v36, %v521_v43  ;;  %2076 = vmatmul.mubr.msk.f32.vlgmr.msra.gmra.mxu0 %vm248_vm5, %v2073_v38  ;;  %2082 = vmatprep.subr.msk.mxu0 %vm252_vm1, %v431_v39 }
  0x99   : > { %2083 = vmatpush1.msk.msra.mxu0 %vm252_vm1, %v430_v42  ;;  %507 = vmatprep.mubr.f32.mxu0 %v2273_v2 }
  0x9a   : > { %v707_v52 = vpop.permute.xlu1 %706  ;;  %2087 = vmatprep.subr.msk.mxu1 %vm252_vm1, %v537_v47  ;;  %v705_v53 = vpop.permute.xlu0 %704  ;;  %2091 = vmatprep.subr.msk.mxu0 %vm252_vm1, %v2367_v1 }
  0x9b   : > { %v709_v54 = vsel %vm708_vm6, %v705_v53, %v707_v52  ;;  %v710_v55 = vsel %vm708_vm6, %v707_v52, %v705_v53  ;;  %2088 = vmatpush1.msk.msra.mxu1 %vm252_vm1, %v536_v46 }
  0x9c   : > { %v724_v57 = vmul.f32 %v2483_v45, %v709_v54  ;;  %v725_v58 = vmul.f32 %v2491_v48, %v710_v55  ;;  %2084 = vmatmul.mubr.msk.f32.vlgmr.msra.gmra.mxu0 %vm248_vm5, %v2081_v50  ;;  %2089 = vmatmul.mubr.msk.f32.vlgmr.msra.gmra.mxu1 %vm248_vm5, %v2086_v51 }
  0x9d   : > { %2092 = vmatpush1.msk.msra.mxu0 %vm252_vm1, %v2359_v0  ;;  %695 = vmatprep.mubr.f32.mxu0 %v2273_v2 }
  0x9e   : > { %v813_v63 = vpop.permute.xlu1 %812  ;;  %2096 = vmatprep.subr.msk.mxu1 %vm252_vm1, %v725_v58  ;;  %v811_v1 = vpop.permute.xlu0 %810  ;;  %801 = vmatprep.mubr.f32.mxu1 %v2273_v2 }
  0x9f   : > { %v815_v3 = vsel %vm814_vm7, %v811_v1, %v813_v63  ;;  %v816_v4 = vsel %vm814_vm7, %v813_v63, %v811_v1  ;;  %2097 = vmatpush1.msk.msra.mxu1 %vm252_vm1, %v724_v57 }
  0xa0   : > { %v830_v9 = vmul.f32 %v2513_v56, %v815_v3  ;;  %v831_v10 = vmul.f32 %v2521_v59, %v816_v4  ;;  %2093 = vmatmul.mubr.msk.f32.vlgmr.msra.gmra.mxu0 %vm248_vm5, %v2090_v61  ;;  %2098 = vmatmul.mubr.msk.f32.vlgmr.msra.gmra.mxu1 %vm248_vm5, %v2095_v62 }
  0xa1   : > { %907 = vmatprep.mubr.f32.mxu0 %v2273_v2  ;;  %1013 = vmatprep.mubr.f32.mxu1 %v2273_v2 }
  0xa2   : > { %v919_v16 = vpop.permute.xlu1 %918  ;;  %2101 = vmatprep.subr.msk.mxu0 %vm252_vm1, %v831_v10  ;;  %v917_v17 = vpop.permute.xlu0 %916 }
  0xa3   : > { %v921_v18 = vsel %vm920_vm8, %v917_v17, %v919_v16  ;;  %v922_v19 = vsel %vm920_vm8, %v919_v16, %v917_v17  ;;  %2102 = vmatpush1.msk.msra.mxu0 %vm252_vm1, %v830_v9 }
  0xa4   : > { %v936_v20 = vmul.f32 %v2543_v8, %v921_v18  ;;  %v937_v21 = vmul.f32 %v2551_v13, %v922_v19  ;;  %2103 = vmatmul.mubr.msk.f32.vlgmr.msra.gmra.mxu0 %vm248_vm5, %v2100_v14 }
  0xa5   : > { %1119 = vmatprep.mubr.f32.mxu0 %v2273_v2 }
  0xa6   : > { %v1025_v30 = vpop.permute.xlu1 %1024  ;;  %2106 = vmatprep.subr.msk.mxu1 %vm252_vm1, %v937_v21  ;;  %v1023_v31 = vpop.permute.xlu0 %1022 }
  0xa7   : > { %v1027_v32 = vsel %vm1026_vm9, %v1023_v31, %v1025_v30  ;;  %v1028_v6 = vsel %vm1026_vm9, %v1025_v30, %v1023_v31  ;;  %2107 = vmatpush1.msk.msra.mxu1 %vm252_vm1, %v936_v20 }
  0xa8   : > { %v1042_v7 = vmul.f32 %v2572_v24, %v1027_v32  ;;  %v1043_v33 = vmul.f32 %v2575_v27, %v1028_v6  ;;  %2108 = vmatmul.mubr.msk.f32.vlgmr.msra.gmra.mxu1 %vm248_vm5, %v2105_v28 }
  0xa9   : > { %1242 = vmatprep.mubr.f32.mxu1 %v2273_v2 }
  0xaa   : > { %2111 = vmatprep.subr.msk.mxu0 %vm252_vm1, %v1043_v33 }
  0xab   : > { %2112 = vmatpush1.msk.msra.mxu0 %vm252_vm1, %v1042_v7 }
  0xac   : > { %2113 = vmatmul.mubr.msk.f32.vlgmr.msra.gmra.mxu0 %vm248_vm5, %v2110_v34 }
  0xad   : > { %1322 = vmatprep.mubr.f32.mxu0 %v2273_v2 }
 0x154   : > { %v405_v35 = vpop.f32.mrf.mxu1 }
 0x156   : > { %v407_v38 = vpop.f32.mrf.mxu1 }
 0x158   : > { %v325_v37 = vpop.f32.mrf.mxu0 }
 0x159   : > { %v406_v39 = vadd.f32 %v405_v35, %v325_v37 }
 0x15a   : > { %v327_v40 = vpop.f32.mrf.mxu0 }
 0x15b   : > { %v408_v41 = vadd.f32 %v407_v38, %v327_v40 }
 0x15c   : > { %v509_v42 = vpop.f32.mrf.mxu0  ;;  %v615_v43 = vpop.f32.mrf.mxu1 }
 0x15d   : > { %v514_v44 = vadd.f32 %v509_v42, %v406_v39 }
 0x15e   : > { %v511_v46 = vpop.f32.mrf.mxu0  ;;  %v617_v47 = vpop.f32.mrf.mxu1 }
 0x15f   : > { %v515_v49 = vadd.f32 %v511_v46, %v408_v41  ;;  %v620_v50 = vadd.f32 %v615_v43, %v514_v44 }
 0x160   : > { %v697_v51 = vpop.f32.mrf.mxu0  ;;  %v803_v52 = vpop.f32.mrf.mxu1 }
 0x161   : > { %v621_v53 = vadd.f32 %v617_v47, %v515_v49  ;;  %v702_v54 = vadd.f32 %v697_v51, %v620_v50 }
 0x162   : > { %v699_v55 = vpop.f32.mrf.mxu0  ;;  %v805_v60 = vpop.f32.mrf.mxu1 }
 0x163   : > { %v703_v57 = vadd.f32 %v699_v55, %v621_v53  ;;  %v808_v58 = vadd.f32 %v803_v52, %v702_v54  ;;  %v2114_v53 = vld [vmem:[%s2769_s3 + $0x4] sm:$0xf] }
 0x164   : > { %v909_v61 = vpop.f32.mrf.mxu0 }
 0x165   : > { %v809_v62 = vadd.f32 %v805_v60, %v703_v57  ;;  %v914_v63 = vadd.f32 %v909_v61, %v808_v58  ;;  %v1158_v60 = vld [vmem:[%s2769_s3] sm:$0xf] }
 0x166   : > { %v911_v1 = vpop.f32.mrf.mxu0 }
 0x167   : > { %v915_v9 = vadd.f32 %v911_v1, %v809_v62 }
 0x168   : > { %v1015_v3 = vpop.f32.mrf.mxu1 }
 0x169   : > { %v1020_v10 = vadd.f32 %v1015_v3, %v914_v63  ;;  %v2121_v3 = vld [vmem:[%s2769_s3 + $0x8] sm:$0xf] }
 0x16a   : > { %v1017_v4 = vpop.f32.mrf.mxu1 }
 0x16b   : > { %v1021_v15 = vadd.f32 %v1017_v4, %v915_v9 }
 0x16c   : > { %v1121_v14 = vpop.f32.mrf.mxu0 }
 0x16d   : > { %v1126_v16 = vadd.f32 %v1121_v14, %v1020_v10 }
 0x16e   : > { %v1123_v17 = vpop.f32.mrf.mxu0 }
 0x16f   : > { %v1127_v18 = vadd.f32 %v1123_v17, %v1021_v15  ;;  %v1128_v19 = vsel %vm252_vm1, %v1126_v16, 0.0  ;;  %v2125_v15 = vld [vmem:[%s2769_s3 + $0xc] sm:$0xf] }
 0x171   : > { %v1129_v20 = vsel %vm252_vm1, %v1127_v18, 0.0 }
 0x172   : > { %v1130_v21 = vadd.f32 %v1129_v20, %v1128_v19 }
 0x174   : > { %1131 = vadd.xlane.f32.xlu0 %v1130_v21  ;;  %v2133_v21 = vld [vmem:[%s2769_s3 + $0x14] sm:$0xf] }
 0x1fd   : > { %v1132_v28 = vpop.xlane.xlu0 %1131 }
 0x1fe   : > { %v1133_v30 = vmul.f32 0.00390625, %v1132_v28 }
 0x200   : > { %v1134_v31 = vsub.f32 %v1126_v16, %v1133_v30  ;;  %v1135_v32 = vsub.f32 %v1127_v18, %v1133_v30  ;;  %v2129_v16 = vld [vmem:[%s2769_s3 + $0x10] sm:$0xf] }
 0x202   : > { %v1136_v6 = vmul.f32 %v1134_v31, %v1134_v31  ;;  %v1137_v7 = vmul.f32 %v1135_v32, %v1135_v32 }
 0x204   : > { %v1138_v33 = vsel %vm252_vm1, %v1136_v6, 0.0  ;;  %v1139_v34 = vsel %vm252_vm1, %v1137_v7, 0.0  ;;  %v2137_v6 = vld [vmem:[%s2769_s3 + $0x18] sm:$0xf] }
 0x205   : > { %v1140_v35 = vadd.f32 %v1139_v34, %v1138_v33 }
 0x207   : > { %1141 = vadd.xlane.f32.xlu1 %v1140_v35 }
 0x290   : > { %v1142_v37 = vpop.xlane.xlu1 %1141 }
 0x291   : > { %v1143_v38 = vmul.f32 0.00390625, %v1142_v37  ;;  %v2141_v37 = vld [vmem:[%s2769_s3 + $0x1c] sm:$0xf] }
 0x293   : > { %v1144_v39 = vadd.f32 1e-05, %v1143_v38 }
 0x295   : > { %2205 = vrsqrt.f32 %v1144_v39 }
 0x2a2   : > { %v2206_v40 = vpop.eup %2205 }
 0x2a3   : > { %v1146_v41 = vmul.f32 %v2206_v40, %v1134_v31  ;;  %v1147_v42 = vmul.f32 %v2206_v40, %v1135_v32 }
 0x2a5   : > { %v1148_v43 = vmax.f32 %v1146_v41, 0.0  ;;  %v1149_v44 = vmax.f32 %v1147_v42, 0.0 }
 0x2a7   : > { %1161 = vrot.lane.b32.xlu1 %v1149_v44, %s2272_s7  ;;  %1159 = vrot.lane.b32.xlu0 %v1148_v43, %s2272_s7  ;;  %s188_s7 = sand.u32 1, %s2261_s16  }
 0x2a8   : > { %s1992_s5 = scalar_lea.sflag [#allocation3], %s188_s7 }
 0x2ab   : > { %1152 = vrot.lane.b32.xlu1 %v1149_v44, %s2271_s6  ;;  %1150 = vrot.lane.b32.xlu0 %v1148_v43, %s2271_s6 }
 0x2af   : > { %1331 = vrot.lane.b32.xlu1 %v1149_v44, %s2274_s8  ;;  %1329 = vrot.lane.b32.xlu0 %v1148_v43, %s2274_s8  ;;  %s2069_s8 = sshll.u32 %s188_s7, 3 }
 0x2b3   : > { %1423 = vrot.lane.b32.xlu1 %v1149_v44, %s2275_s9  ;;  %1421 = vrot.lane.b32.xlu0 %v1148_v43, %s2275_s9  ;;  %s2155_s9 = sshll.u32 %s2327_s19, 7  ;;  %s2215_s19 = scalar_lea.vmem %s2214_s22, 256 }
 0x2b4   : > { %s2004_s30 = scalar_lea.hbm %s2770_s4, %s2155_s9 }
 0x2b7   : > { %1599 = vrot.lane.b32.xlu1 %v1149_v44, %s2276_s10  ;;  %1597 = vrot.lane.b32.xlu0 %v1148_v43, %s2276_s10  ;;  %s190_s10 = scalar_lea.vmem [#allocation2], %s2069_s8 }
 0x2bb   : > { %1691 = vrot.lane.b32.xlu1 %v1149_v44, %s2277_s11  ;;  %1689 = vrot.lane.b32.xlu0 %v1148_v43, %s2277_s11  ;;  %s2006_s11 = sshll.u32 %s190_s10, 4  ;;  %s2007_s11 = int_to_ptr.vmem [resolvable:$true] %s2006_s11 }
 0x2bc   : > { %s2209_s14 = scalar_lea.vmem %s2007_s11, 128  ;;  %p2216_p0 = scmp.lt.s32.totalorder %s2007_s11, %s2214_s22 }
 0x2bd   : > { %p2210_p11 = scmp.ne.s32.totalorder %s2007_s11, %s2209_s14  ;;  %p2217_p1 = scmp.lt.s32.totalorder %s2215_s19, %s2209_s14 }
 0x2bf   : > { %1783 = vrot.lane.b32.xlu1 %v1149_v44, %s2278_s12  ;;  %1781 = vrot.lane.b32.xlu0 %v1148_v43, %s2278_s12  ;;  %p2211_p12 = pnand %p2210_p11, %p2344_p5  ;;  %p2218_p2 = por %p2217_p1, %p2216_p0 }
 0x2c1   : > { %p2212_p13 = pneg %p2211_p12 }
 0x2c3   : > { %1875 = vrot.lane.b32.xlu1 %v1149_v44, %s2279_s13  ;;  %1873 = vrot.lane.b32.xlu0 %v1148_v43, %s2279_s13  ;;  %p2219_p3 = pnand %p2218_p2, %p2212_p13 }
 0x319   : > { %v1162_v46 = vpop.permute.xlu1 %1161  ;;  %v1160_v47 = vpop.permute.xlu0 %1159 }
 0x31a   : > { %v1163_v49 = vsel %vm228_vm3, %v1160_v47, %v1162_v46  ;;  %v1164_v50 = vsel %vm228_vm3, %v1162_v46, %v1160_v47 }
 0x31b   : > { %v1165_v51 = vmul.f32 %v1164_v50, %v2433_v22  ;;  %v1166_v52 = vmul.f32 %v1163_v49, %v2436_v23 }
 0x31d   : > { %v1153_v54 = vpop.permute.xlu1 %1152  ;;  %2115 = vmatprep.subr.msk.mxu1 %vm252_vm1, %v1166_v52  ;;  %v1151_v55 = vpop.permute.xlu0 %1150 }
 0x31e   : > { %v1154_v57 = vsel %vm206_vm0, %v1151_v55, %v1153_v54  ;;  %v1155_v58 = vsel %vm206_vm0, %v1153_v54, %v1151_v55  ;;  %2116 = vmatpush1.msk.msra.mxu1 %vm252_vm1, %v1165_v51 }
 0x31f   : > { %v1156_v22 = vmul.f32 %v1155_v58, %v2410_v11  ;;  %v1157_v23 = vmul.f32 %v1154_v57, %v2413_v12  ;;  %2117 = vmatmul.mubr.msk.f32.vlgmr.msra.gmra.mxu1 %vm248_vm5, %v2114_v53 }
 0x320   : > { %1412 = vmatprep.mubr.f32.mxu1 %v2273_v2 }
 0x321   : > { %v1332_v61 = vpop.permute.xlu1 %1331  ;;  %2118 = vmatprep.subr.msk.mxu0 %vm252_vm1, %v1157_v23  ;;  %v1330_v62 = vpop.permute.xlu0 %1329 }
 0x322   : > { %v1333_v63 = vsel %vm414_vm2, %v1330_v62, %v1332_v61  ;;  %v1334_v11 = vsel %vm414_vm2, %v1332_v61, %v1330_v62  ;;  %2119 = vmatpush1.msk.msra.mxu0 %vm252_vm1, %v1156_v22 }
 0x323   : > { %v1335_v12 = vmul.f32 %v1334_v11, %v2443_v25  ;;  %v1336_v1 = vmul.f32 %v1333_v63, %v2446_v26  ;;  %2120 = vmatmul.mubr.msk.f32.vlgmr.msra.gmra.mxu0 %vm248_vm5, %v1158_v60 }
 0x324   : > { %1504 = vmatprep.mubr.f32.mxu0 %v2273_v2 }
 0x325   : > { %v1424_v4 = vpop.permute.xlu1 %1423  ;;  %2122 = vmatprep.subr.msk.mxu1 %vm252_vm1, %v1336_v1  ;;  %v1422_v9 = vpop.permute.xlu0 %1421 }
 0x326   : > { %v1425_v10 = vsel %vm520_vm4, %v1422_v9, %v1424_v4  ;;  %v1426_v25 = vsel %vm520_vm4, %v1424_v4, %v1422_v9  ;;  %2123 = vmatpush1.msk.msra.mxu1 %vm252_vm1, %v1335_v12 }
 0x327   : > { %v1427_v26 = vmul.f32 %v1426_v25, %v2450_v29  ;;  %v1428_v14 = vmul.f32 %v1425_v10, %v2464_v36  ;;  %2130 = vmatprep.subr.msk.mxu1 %vm252_vm1, %v1149_v44  ;;  %2124 = vmatmul.mubr.msk.f32.vlgmr.msra.gmra.mxu1 %vm248_vm5, %v2121_v3 }
 0x328   : > { %2131 = vmatpush1.msk.msra.mxu1 %vm252_vm1, %v1148_v43  ;;  %1588 = vmatprep.mubr.f32.mxu1 %v2273_v2 }
 0x329   : > { %v1600_v17 = vpop.permute.xlu1 %1599  ;;  %2126 = vmatprep.subr.msk.mxu0 %vm252_vm1, %v1428_v14  ;;  %v1598_v29 = vpop.permute.xlu0 %1597 }
 0x32a   : > { %v1601_v36 = vsel %vm708_vm6, %v1598_v29, %v1600_v17  ;;  %v1602_v18 = vsel %vm708_vm6, %v1600_v17, %v1598_v29  ;;  %2127 = vmatpush1.msk.msra.mxu0 %vm252_vm1, %v1427_v26 }
 0x32b   : > { %v1603_v19 = vmul.f32 %v1601_v36, %v2483_v45  ;;  %v1604_v20 = vmul.f32 %v1602_v18, %v2491_v48  ;;  %2128 = vmatmul.mubr.msk.f32.vlgmr.msra.gmra.mxu0 %vm248_vm5, %v2125_v15  ;;  %2132 = vmatmul.mubr.msk.f32.vlgmr.msra.gmra.mxu1 %vm248_vm5, %v2129_v16 }
 0x32c   : > { %1680 = vmatprep.mubr.f32.mxu0 %v2273_v2  ;;  %1772 = vmatprep.mubr.f32.mxu1 %v2273_v2 }
 0x32d   : > { %v1692_v28 = vpop.permute.xlu1 %1691  ;;  %2134 = vmatprep.subr.msk.mxu0 %vm252_vm1, %v1604_v20  ;;  %v1690_v30 = vpop.permute.xlu0 %1689 }
 0x32e   : > { %v1693_v45 = vsel %vm814_vm7, %v1690_v30, %v1692_v28  ;;  %v1694_v48 = vsel %vm814_vm7, %v1692_v28, %v1690_v30  ;;  %2135 = vmatpush1.msk.msra.mxu0 %vm252_vm1, %v1603_v19 }
 0x32f   : > { %v1695_v31 = vmul.f32 %v1693_v45, %v2513_v56  ;;  %v1696_v32 = vmul.f32 %v1694_v48, %v2521_v59  ;;  %2136 = vmatmul.mubr.msk.f32.vlgmr.msra.gmra.mxu0 %vm248_vm5, %v2133_v21 }
 0x330   : > { %1864 = vmatprep.mubr.f32.mxu0 %v2273_v2 }
 0x331   : > { %v1784_v7 = vpop.permute.xlu1 %1783  ;;  %2138 = vmatprep.subr.msk.mxu1 %vm252_vm1, %v1696_v32  ;;  %v1782_v33 = vpop.permute.xlu0 %1781 }
 0x332   : > { %v1785_v34 = vsel %vm920_vm8, %v1782_v33, %v1784_v7  ;;  %v1786_v56 = vsel %vm920_vm8, %v1784_v7, %v1782_v33  ;;  %2139 = vmatpush1.msk.msra.mxu1 %vm252_vm1, %v1695_v31 }
 0x333   : > { %v1787_v59 = vmul.f32 %v1785_v34, %v2543_v8  ;;  %v1788_v35 = vmul.f32 %v1786_v56, %v2551_v13  ;;  %2140 = vmatmul.mubr.msk.f32.vlgmr.msra.gmra.mxu1 %vm248_vm5, %v2137_v6 }
 0x334   : > { %1956 = vmatprep.mubr.f32.mxu1 %v2273_v2  ;;  %v2145_v2 = vld [vmem:[%s2769_s3 + $0x20] sm:$0xf] }
 0x335   : > { %v1876_v38 = vpop.permute.xlu1 %1875  ;;  %2142 = vmatprep.subr.msk.mxu0 %vm252_vm1, %v1788_v35  ;;  %v1874_v39 = vpop.permute.xlu0 %1873 }
 0x336   : > { %v1877_v40 = vsel %vm1026_vm9, %v1874_v39, %v1876_v38  ;;  %v1878_v8 = vsel %vm1026_vm9, %v1876_v38, %v1874_v39  ;;  %2143 = vmatpush1.msk.msra.mxu0 %vm252_vm1, %v1787_v59 }
 0x337   : > { %v1879_v13 = vmul.f32 %v1877_v40, %v2572_v24  ;;  %v1880_v41 = vmul.f32 %v1878_v8, %v2575_v27  ;;  %2144 = vmatmul.mubr.msk.f32.vlgmr.msra.gmra.mxu0 %vm248_vm5, %v2141_v37 }
 0x339   : > { %2146 = vmatprep.subr.msk.mxu1 %vm252_vm1, %v1880_v41 }
 0x33a   : > { %2147 = vmatpush1.msk.msra.mxu1 %vm252_vm1, %v1879_v13 }
 0x33b   : > { %2148 = vmatmul.mubr.msk.f32.vlgmr.msra.gmra.mxu1 %vm248_vm5, %v2145_v2 }
 0x3df   : > { %v1244_v5 = vpop.f32.mrf.mxu1 }
 0x3e1   : > { %v1246_v42 = vpop.f32.mrf.mxu1 }
 0x3e3   : > { %v1324_v43 = vpop.f32.mrf.mxu0 }
 0x3e4   : > { %v1325_v44 = vadd.f32 %v1324_v43, %v1244_v5 }
 0x3e5   : > { %v1326_v46 = vpop.f32.mrf.mxu0 }
 0x3e6   : > { %v1327_v24 = vadd.f32 %v1326_v46, %v1246_v42 }
 0x3e7   : > { %v1414_v47 = vpop.f32.mrf.mxu1 }
 0x3e8   : > { %v1419_v27 = vadd.f32 %v1414_v47, %v1325_v44 }
 0x3e9   : > { %v1416_v49 = vpop.f32.mrf.mxu1 }
 0x3ea   : > { %v1420_v50 = vadd.f32 %v1416_v49, %v1327_v24 }
 0x3eb   : > { %v1506_v51 = vpop.f32.mrf.mxu0  ;;  %v1590_v52 = vpop.f32.mrf.mxu1 }
 0x3ec   : > { %v1511_v53 = vadd.f32 %v1506_v51, %v1419_v27 }
 0x3ed   : > { %v1508_v54 = vpop.f32.mrf.mxu0  ;;  %v1592_v58 = vpop.f32.mrf.mxu1 }
 0x3ee   : > { %v1512_v55 = vadd.f32 %v1508_v54, %v1420_v50  ;;  %v1595_v57 = vadd.f32 %v1590_v52, %v1511_v53 }
 0x3ef   : > { %v1682_v22 = vpop.f32.mrf.mxu0 }
 0x3f0   : > { %v1596_v23 = vadd.f32 %v1592_v58, %v1512_v55  ;;  %v1687_v60 = vadd.f32 %v1682_v22, %v1595_v57 }
 0x3f1   : > { %v1684_v61 = vpop.f32.mrf.mxu0 }
 0x3f2   : > { %v1688_v63 = vadd.f32 %v1684_v61, %v1596_v23 }
 0x3f3   : > { %v1774_v62 = vpop.f32.mrf.mxu1 }
 0x3f4   : > { %v1779_v11 = vadd.f32 %v1774_v62, %v1687_v60 }
 0x3f5   : > { %v1776_v12 = vpop.f32.mrf.mxu1 }
 0x3f6   : > { %v1780_v4 = vadd.f32 %v1776_v12, %v1688_v63 }
 0x3f7   : > { %v1866_v1 = vpop.f32.mrf.mxu0 }
 0x3f8   : > { %v1871_v9 = vadd.f32 %v1866_v1, %v1779_v11 }
 0x3f9   : > { %v1868_v3 = vpop.f32.mrf.mxu0 }
 0x3fa   : > { %v1872_v25 = vadd.f32 %v1868_v3, %v1780_v4 }
 0x3fb   : > { %v1958_v10 = vpop.f32.mrf.mxu1 }
 0x3fc   : > { %v1963_v26 = vadd.f32 %v1958_v10, %v1871_v9 }
 0x3fd   : > { %v1960_v14 = vpop.f32.mrf.mxu1 }
 0x3fe   : > { %v1964_v15 = vadd.f32 %v1960_v14, %v1872_v25  ;;  %v1965_v16 = vsel %vm252_vm1, %v1963_v26, 0.0 }
 0x400   : > { %v1966_v17 = vsel %vm252_vm1, %v1964_v15, 0.0 }
 0x401   : > { %v1967_v29 = vadd.f32 %v1966_v17, %v1965_v16 }
 0x403   : > { %1968 = vadd.xlane.f32.xlu0 %v1967_v29 }
 0x48c   : > { %v1969_v36 = vpop.xlane.xlu0 %1968 }
 0x48d   : > { %v1970_v18 = vmul.f32 0.00390625, %v1969_v36 }
 0x48f   : > { %v1971_v19 = vsub.f32 %v1963_v26, %v1970_v18  ;;  %v1972_v20 = vsub.f32 %v1964_v15, %v1970_v18 }
 0x491   : > { %v1973_v21 = vmul.f32 %v1971_v19, %v1971_v19  ;;  %v1974_v28 = vmul.f32 %v1972_v20, %v1972_v20 }
 0x493   : > { %v1975_v30 = vsel %vm252_vm1, %v1973_v21, 0.0  ;;  %v1976_v45 = vsel %vm252_vm1, %v1974_v28, 0.0 }
 0x494   : > { %v1977_v48 = vadd.f32 %v1976_v45, %v1975_v30 }
 0x496   : > { %1978 = vadd.xlane.f32.xlu1 %v1977_v48 }
 0x51f   : > { %v1979_v31 = vpop.xlane.xlu1 %1978 }
 0x520   : > { %v1980_v32 = vmul.f32 0.00390625, %v1979_v31 }
 0x522   : > { %v1981_v6 = vadd.f32 1e-05, %v1980_v32 }
 0x524   : > { %2207 = vrsqrt.f32 %v1981_v6 }
 0x531   : > { %v2208_v7 = vpop.eup %2207 }
 0x532   : > { %v1983_v33 = vmul.f32 %v2208_v7, %v1971_v19  ;;  %v1984_v34 = vmul.f32 %v2208_v7, %v1972_v20 }
 0x534   : > { %v1987_v56 = vcombine.low %v1983_v33, %v1984_v34 }
 0x536   : > { %v1989_v59 = vadd.f32 %v1987_v56, %v2359_v0 }
 0x538   : > { %1990 = vst [vmem:[%s190_s10] sm:$0xff] %v1989_v59 }
 0x539   : > { %2222 = shalt.err (!%p2219_p3)
}
 0x53a   : > { %s2223_s23 = scalar_lea.hbm %s2004_s30, 128  ;;  %s2227_s29 = scalar_lea.hbm %s2770_s4, 256 }
 0x53b   : > { %p2224_p4 = scmp.ne.s32.totalorder %s2004_s30, %s2223_s23  ;;  %p2228_p9 = scmp.lt.s32.totalorder %s2004_s30, %s2770_s4 }
 0x53c   : > { %p2229_p10 = scmp.lt.s32.totalorder %s2227_s29, %s2223_s23 }
 0x53d   : > { %p2225_p7 = pnand %p2224_p4, %p2344_p5 }
 0x53e   : > { %p2230_p11 = por %p2229_p10, %p2228_p9 }
 0x53f   : > { %p2226_p8 = pneg %p2225_p7 }
 0x541   : > { %p2231_p12 = pnand %p2230_p11, %p2226_p8 }
 0x543   : > { %2234 = shalt.err (!%p2231_p12)
}
 0x544   : > { %2156 = dma.vmem_to_hbm [thread:$0]  (%p2344_p5), %s2007_s11, 128, %s2004_s30, %s1992_s5  }
 0x545 PF: > { %p2162_p13 = scmp.ge.s32.totalorder %s2269_s18, 2  ;;  %s2018_s8 = sand.u32 1, %s2257_s15  }
 0x546   : > { %s2019_s9 = scalar_lea.sflag [#allocation3], %s2018_s8 }
 0x547   : > { %p2159_p0 = pnand %p2162_p13, %p2348_p6 }
 0x549   : > { %p2160_p1 = pneg %p2159_p0 }
 0x54b   : > { %2252 = dma.done.wait (%p2160_p1), %s2019_s9, 128  }
 0x54c   : > { %2254 = vsyncadd (%p2160_p1), %s2019_s9, 4294967168  ;;  %p14_p2 = scmp.ge.s32.totalorder %s2331_s21, 4   ;;  %s2773_s15 = smov %s2261_s16 }
 0x54d   : > { %s2774_s16 = smov %s2265_s17  ;;  %s2775_s17 = smov %s2342_s24 }
 0x54e   : > { %s2776_s18 = smov %s2331_s21  ;;  %16 = sbr.rel (!%p14_p2) target bundleno = 3 (0x3), region = 94 }
 0x553   :  { %2024 = vsyncpa [#allocation3], 1 }
 0x554   :  { %2026 = vsyncpa [#allocation3 + $0x1], 1 }

</bundles_post_ra>
